<compile_context>
chip_gen: v7x
topology: tpu7x:2x2x1
jax: 0.10.0
libtpu: 0.0.40
codegen_flags: <defaults>
</compile_context>

<pallas_src>
import functools

import jax
import jax.numpy as jnp
from jax.experimental import pallas as pl
from jax.experimental.pallas import tpu as pltpu


# ---------------------------------------------------------------------------
# Fused kernel: one decoder layer per grid step, activation resident in VMEM
# ---------------------------------------------------------------------------
def fused_layers_kernel(x_ref,
                        w_in_ref, b_in_ref,
                        w_q_ref, b_q_ref,
                        w_k_ref, b_k_ref,
                        w_v_ref, b_v_ref,
                        w_o_ref, b_o_ref,
                        w_val_ref, b_val_ref,
                        w_gate_ref, b_gate_ref,
                        w_fc2_ref, b_fc2_ref,
                        out_ref,
                        act_ref,
                        *, num_heads, head_dim):
    layer = pl.program_id(1)
    num_layers = pl.num_programs(1)
    bf16 = jnp.bfloat16

    # First layer for this batch element: load the embedding block into the
    # layer-resident VMEM activation.
    @pl.when(layer == 0)
    def _():
        act_ref[...] = x_ref[0]

    x = act_ref[...]                                   # (S, H) f32
    S, H = x.shape

    # --- CausalSelfAttention -------------------------------------------------
    xb = x.astype(bf16)
    h = jnp.dot(xb, w_in_ref[0],
                preferred_element_type=jnp.float32) + b_in_ref[0]      # input_proj
    hb = h.astype(bf16)

    # q projection weights were pre-scaled by 1/sqrt(head_dim) in the wrapper.
    q = jnp.dot(hb, w_q_ref[0], preferred_element_type=jnp.float32) + b_q_ref[0]
    k = jnp.dot(hb, w_k_ref[0], preferred_element_type=jnp.float32) + b_k_ref[0]
    v = jnp.dot(hb, w_v_ref[0], preferred_element_type=jnp.float32) + b_v_ref[0]

    qb, kb, vb = q.astype(bf16), k.astype(bf16), v.astype(bf16)

    # Pack heads onto a leading batch axis -> one batched dot for all heads.
    def split_heads(t):
        return jnp.stack(
            [t[:, i * head_dim:(i + 1) * head_dim] for i in range(num_heads)],
            axis=0)                                    # (nh, S, hd)

    qh, kh, vh = split_heads(qb), split_heads(kb), split_heads(vb)

    s = jnp.einsum('hqd,hkd->hqk', qh, kh,
                   preferred_element_type=jnp.float32)          # (nh, S, S) f32

    q_idx = jax.lax.broadcasted_iota(jnp.int32, (S, S), 0)
    k_idx = jax.lax.broadcasted_iota(jnp.int32, (S, S), 1)
    causal = k_idx <= q_idx                                      # is_causal=True
    s = jnp.where(causal, s, -jnp.inf)

    s = s - jnp.max(s, axis=-1, keepdims=True)
    p = jnp.exp(s)
    denom = jnp.sum(p, axis=-1, keepdims=True)
    p = p * pl.reciprocal(denom, approx=True)                    # EUP divide

    ctx = jnp.einsum('hqk,hkd->hqd', p.astype(bf16), vh,
                     preferred_element_type=jnp.float32)         # (nh, S, hd)
    ctx = jnp.concatenate([ctx[i] for i in range(num_heads)], axis=-1)  # (S, H)

    attn = jnp.dot(ctx.astype(bf16), w_o_ref[0],
                   preferred_element_type=jnp.float32) + b_o_ref[0]

    # --- MLP (SwiGLU) with fc_1 split into val / gate dots --------------------
    ab = attn.astype(bf16)
    val = jnp.dot(ab, w_val_ref[0],
                  preferred_element_type=jnp.float32) + b_val_ref[0]
    gate = jnp.dot(ab, w_gate_ref[0],
                   preferred_element_type=jnp.float32) + b_gate_ref[0]
    act = (gate * jax.nn.sigmoid(gate)) * val                    # silu(gate) * x
    y = jnp.dot(act.astype(bf16), w_fc2_ref[0],
                preferred_element_type=jnp.float32) + b_fc2_ref[0]

    # Carry activation to the next layer; emit only after the final layer.
    act_ref[...] = y

    @pl.when(layer == num_layers - 1)
    def _():
        out_ref[0] = y.astype(out_ref.dtype)


# ---------------------------------------------------------------------------
# Wrapper: embedding gather (glue) + single fused pallas_call over all layers
# ---------------------------------------------------------------------------
def nano_decoder_pallas(input_ids, emb, params, *, num_heads, head_dim):
    (w_in, b_in, w_q, b_q, w_k, b_k, w_v, b_v, w_o, b_o,
     w_val, b_val, w_gate, b_gate, w_fc2, b_fc2) = params
    L, H, _ = w_in.shape
    B, S = input_ids.shape

    x = emb[input_ids].astype(jnp.float32)                       # (B, S, H)

    # Fold the 1/sqrt(head_dim) attention scale into the q projection.
    scale = 1.0 / (float(head_dim) ** 0.5)
    w_q_s = w_q * scale
    b_q_s = b_q * scale

    def prep_w(w):                  # weights -> bf16 (MXU-native, half the DMA)
        return w.astype(jnp.bfloat16)

    def prep_b(b):                  # biases -> (L, 1, N) f32 for broadcasting
        return b.reshape(L, 1, -1).astype(jnp.float32)

    kargs = (prep_w(w_in), prep_b(b_in),
             prep_w(w_q_s), prep_b(b_q_s),
             prep_w(w_k), prep_b(b_k),
             prep_w(w_v), prep_b(b_v),
             prep_w(w_o), prep_b(b_o),
             prep_w(w_val), prep_b(b_val),
             prep_w(w_gate), prep_b(b_gate),
             prep_w(w_fc2), prep_b(b_fc2))

    weight_specs = [
        pl.BlockSpec((1,) + tuple(a.shape[1:]), lambda b, l: (l, 0, 0))
        for a in kargs
    ]

    kernel = functools.partial(fused_layers_kernel,
                               num_heads=num_heads, head_dim=head_dim)

    return pl.pallas_call(
        kernel,
        out_shape=jax.ShapeDtypeStruct((B, S, H), jnp.float32),
        grid=(B, L),
        in_specs=[pl.BlockSpec((1, S, H), lambda b, l: (b, 0, 0))] + weight_specs,
        out_specs=pl.BlockSpec((1, S, H), lambda b, l: (b, 0, 0)),
        scratch_shapes=[pltpu.VMEM((S, H), jnp.float32)],
        compiler_params=pltpu.CompilerParams(
            dimension_semantics=("parallel", "arbitrary"),
            vmem_limit_bytes=48 * 1024 * 1024),
    )(x, *kargs)


# ---------------------------------------------------------------------------
# Parameters (deterministic synthetic init, stacked over layers)
# ---------------------------------------------------------------------------
def make_params(key, vocab_size, hidden, intermediate, num_layers):
    ks = jax.random.split(key, 17)
    emb = jax.random.normal(ks[0], (vocab_size, hidden), jnp.float32)

    def w(k, shape):
        fan_in = shape[-2]
        return jax.random.normal(k, shape, jnp.float32) / jnp.sqrt(float(fan_in))

    def b(k, shape):
        return jax.random.normal(k, shape, jnp.float32) * 0.1

    L, H, I = num_layers, hidden, intermediate
    params = (
        w(ks[1], (L, H, H)),  b(ks[2], (L, H)),        # input_proj
        w(ks[3], (L, H, H)),  b(ks[4], (L, H)),        # q (qkv split)
        w(ks[5], (L, H, H)),  b(ks[6], (L, H)),        # k
        w(ks[7], (L, H, H)),  b(ks[8], (L, H)),        # v
        w(ks[9], (L, H, H)),  b(ks[10], (L, H)),       # o_proj
        w(ks[11], (L, H, I)), b(ks[12], (L, I)),       # fc_1 first half  (val)
        w(ks[13], (L, H, I)), b(ks[14], (L, I)),       # fc_1 second half (gate)
        w(ks[15], (L, I, H)), b(ks[16], (L, H)),       # fc_2
    )
    return emb, params


# ---------------------------------------------------------------------------
# Pure-JAX f32 reference (mirrors the PyTorch forward exactly)
# ---------------------------------------------------------------------------
def ref_model(input_ids, emb, params, *, num_heads, head_dim):
    (w_in, b_in, w_q, b_q, w_k, b_k, w_v, b_v, w_o, b_o,
     w_val, b_val, w_gate, b_gate, w_fc2, b_fc2) = params
    x = emb[input_ids]
    L = w_in.shape[0]
    B, S, H = x.shape
    mask = jnp.tril(jnp.ones((S, S), bool))

    def heads(t):
        return t.reshape(B, S, num_heads, head_dim).transpose(0, 2, 1, 3)

    for i in range(L):
        h = x @ w_in[i] + b_in[i]
        q = h @ w_q[i] + b_q[i]
        k = h @ w_k[i] + b_k[i]
        v = h @ w_v[i] + b_v[i]
        qh, kh, vh = heads(q), heads(k), heads(v)
        s = jnp.einsum('bhqd,bhkd->bhqk', qh, kh) / (head_dim ** 0.5)
        s = jnp.where(mask, s, -jnp.inf)
        p = jax.nn.softmax(s, axis=-1)
        ctx = jnp.einsum('bhqk,bhkd->bhqd', p, vh)
        ctx = ctx.transpose(0, 2, 1, 3).reshape(B, S, H)
        attn = ctx @ w_o[i] + b_o[i]
        val = attn @ w_val[i] + b_val[i]           # fc_1 then chunk: (x, gate)
        gate = attn @ w_gate[i] + b_gate[i]
        x = (jax.nn.silu(gate) * val) @ w_fc2[i] + b_fc2[i]
    return x


# ---------------------------------------------------------------------------
if __name__ == "__main__":
    vocab_size = 64
    hidden = 32
    num_heads = 4
    head_dim = hidden // num_heads
    intermediate = 64
    num_layers = 2
    batch, seq = 2, 8

    key = jax.random.PRNGKey(0)
    k_par, k_ids = jax.random.split(key)
    emb, params = make_params(k_par, vocab_size, hidden, intermediate, num_layers)
    input_ids = jax.random.randint(k_ids, (batch, seq), 0, vocab_size,
                                   dtype=jnp.int32)

    out = nano_decoder_pallas(input_ids, emb, params,
                              num_heads=num_heads, head_dim=head_dim)
    out = jax.block_until_ready(out)

    ref = ref_model(input_ids, emb, params,
                    num_heads=num_heads, head_dim=head_dim)

    assert out.shape == (batch, seq, hidden)
    # bf16 MXU operands + approx reciprocal -> relaxed (relative) tolerance.
    rel_err = float(jnp.max(jnp.abs(out - ref)) / (jnp.max(jnp.abs(ref)) + 1e-8))
    assert rel_err < 5e-2, f"mismatch vs reference (rel_err={rel_err})"

    print("KERNEL_OK")
</pallas_src>

<mosaic_0001>
module attributes {stable_mosaic.version = 11 : i64} {
  func.func @fused_layers_kernel(%arg0: i32, %arg1: i32, %arg2: memref<1x8x32xf32, #tpu.memory_space<vmem>>, %arg3: memref<1x32x32xbf16, #tpu.memory_space<vmem>>, %arg4: memref<1x1x32xf32, #tpu.memory_space<vmem>>, %arg5: memref<1x32x32xbf16, #tpu.memory_space<vmem>>, %arg6: memref<1x1x32xf32, #tpu.memory_space<vmem>>, %arg7: memref<1x32x32xbf16, #tpu.memory_space<vmem>>, %arg8: memref<1x1x32xf32, #tpu.memory_space<vmem>>, %arg9: memref<1x32x32xbf16, #tpu.memory_space<vmem>>, %arg10: memref<1x1x32xf32, #tpu.memory_space<vmem>>, %arg11: memref<1x32x32xbf16, #tpu.memory_space<vmem>>, %arg12: memref<1x1x32xf32, #tpu.memory_space<vmem>>, %arg13: memref<1x32x64xbf16, #tpu.memory_space<vmem>>, %arg14: memref<1x1x64xf32, #tpu.memory_space<vmem>>, %arg15: memref<1x32x64xbf16, #tpu.memory_space<vmem>>, %arg16: memref<1x1x64xf32, #tpu.memory_space<vmem>>, %arg17: memref<1x64x32xbf16, #tpu.memory_space<vmem>>, %arg18: memref<1x1x32xf32, #tpu.memory_space<vmem>>, %arg19: memref<1x8x32xf32, #tpu.memory_space<vmem>>, %arg20: memref<8x32xf32, #tpu.memory_space<vmem>>) attributes {dimension_semantics = [#tpu.dimension_semantics<parallel>, #tpu.dimension_semantics<arbitrary>], iteration_bounds = array<i64: 2, 2>, scalar_prefetch = 0 : i64, scratch_operands = 1 : i64, tpu.core_type = #tpu.core_type<tc>, window_params = [{transform_indices = @transform_0, window_bounds = array<i64: 1, 8, 32>}, {transform_indices = @transform_1, window_bounds = array<i64: 1, 32, 32>}, {transform_indices = @transform_2, window_bounds = array<i64: 1, 1, 32>}, {transform_indices = @transform_3, window_bounds = array<i64: 1, 32, 32>}, {transform_indices = @transform_4, window_bounds = array<i64: 1, 1, 32>}, {transform_indices = @transform_5, window_bounds = array<i64: 1, 32, 32>}, {transform_indices = @transform_6, window_bounds = array<i64: 1, 1, 32>}, {transform_indices = @transform_7, window_bounds = array<i64: 1, 32, 32>}, {transform_indices = @transform_8, window_bounds = array<i64: 1, 1, 32>}, {transform_indices = @transform_9, window_bounds = array<i64: 1, 32, 32>}, {transform_indices = @transform_10, window_bounds = array<i64: 1, 1, 32>}, {transform_indices = @transform_11, window_bounds = array<i64: 1, 32, 64>}, {transform_indices = @transform_12, window_bounds = array<i64: 1, 1, 64>}, {transform_indices = @transform_13, window_bounds = array<i64: 1, 32, 64>}, {transform_indices = @transform_14, window_bounds = array<i64: 1, 1, 64>}, {transform_indices = @transform_15, window_bounds = array<i64: 1, 64, 32>}, {transform_indices = @transform_16, window_bounds = array<i64: 1, 1, 32>}, {transform_indices = @transform_17, window_bounds = array<i64: 1, 8, 32>}]} {
    %c0_i32 = arith.constant 0 : i32
    %0 = arith.cmpi eq, %arg1, %c0_i32 : i32
    %1 = arith.extui %0 : i1 to i32
    %c0_i32_0 = arith.constant 0 : i32
    %2 = arith.cmpi ne, %1, %c0_i32_0 : i32
    scf.if %2 {
      %c0_66 = arith.constant 0 : index
      %c0_67 = arith.constant 0 : index
      %c0_68 = arith.constant 0 : index
      %135 = vector.load %arg2[%c0_66, %c0_67, %c0_68] : memref<1x8x32xf32, #tpu.memory_space<vmem>>, vector<1x8x32xf32>
      %136 = vector.shape_cast %135 : vector<1x8x32xf32> to vector<8x32xf32>
      %c0_69 = arith.constant 0 : index
      %c0_70 = arith.constant 0 : index
      %137 = vector.load %arg20[%c0_69, %c0_70] : memref<8x32xf32, #tpu.memory_space<vmem>>, vector<8x32xf32>
      tpu.vector_store %arg20[%c0_69, %c0_70], %136 {strides = array<i32>} : memref<8x32xf32, #tpu.memory_space<vmem>>, vector<8x32xf32>,
    } else {
    }
    %c0 = arith.constant 0 : index
    %c0_1 = arith.constant 0 : index
    %3 = vector.load %arg20[%c0, %c0_1] : memref<8x32xf32, #tpu.memory_space<vmem>>, vector<8x32xf32>
    %4 = arith.truncf %3 : vector<8x32xf32> to vector<8x32xbf16>
    %c0_2 = arith.constant 0 : index
    %c0_3 = arith.constant 0 : index
    %c0_4 = arith.constant 0 : index
    %5 = vector.load %arg3[%c0_2, %c0_3, %c0_4] : memref<1x32x32xbf16, #tpu.memory_space<vmem>>, vector<1x32x32xbf16>
    %6 = vector.shape_cast %5 : vector<1x32x32xbf16> to vector<32x32xbf16>
    %cst = arith.constant dense<0.000000e+00> : vector<8x32xf32>
    %7 = tpu.matmul %4, %6, %cst {dimension_numbers = #tpu.dot_dimension_numbers<[1], [0], [0], [1], [0, 0, 1, 1], [], []>} : vector<8x32xbf16>, vector<32x32xbf16>, vector<8x32xf32> -> vector<8x32xf32>
    %c0_5 = arith.constant 0 : index
    %c0_6 = arith.constant 0 : index
    %c0_7 = arith.constant 0 : index
    %8 = vector.load %arg4[%c0_5, %c0_6, %c0_7] : memref<1x1x32xf32, #tpu.memory_space<vmem>>, vector<1x1x32xf32>
    %9 = vector.shape_cast %8 : vector<1x1x32xf32> to vector<1x32xf32>
    %10 = vector.broadcast %9 : vector<1x32xf32> to vector<8x32xf32>
    %11 = arith.addf %7, %10 : vector<8x32xf32>
    %12 = arith.truncf %11 : vector<8x32xf32> to vector<8x32xbf16>
    %c0_8 = arith.constant 0 : index
    %c0_9 = arith.constant 0 : index
    %c0_10 = arith.constant 0 : index
    %13 = vector.load %arg5[%c0_8, %c0_9, %c0_10] : memref<1x32x32xbf16, #tpu.memory_space<vmem>>, vector<1x32x32xbf16>
    %14 = vector.shape_cast %13 : vector<1x32x32xbf16> to vector<32x32xbf16>
    %cst_11 = arith.constant dense<0.000000e+00> : vector<8x32xf32>
    %15 = tpu.matmul %12, %14, %cst_11 {dimension_numbers = #tpu.dot_dimension_numbers<[1], [0], [0], [1], [0, 0, 1, 1], [], []>} : vector<8x32xbf16>, vector<32x32xbf16>, vector<8x32xf32> -> vector<8x32xf32>
    %c0_12 = arith.constant 0 : index
    %c0_13 = arith.constant 0 : index
    %c0_14 = arith.constant 0 : index
    %16 = vector.load %arg6[%c0_12, %c0_13, %c0_14] : memref<1x1x32xf32, #tpu.memory_space<vmem>>, vector<1x1x32xf32>
    %17 = vector.shape_cast %16 : vector<1x1x32xf32> to vector<1x32xf32>
    %18 = vector.broadcast %17 : vector<1x32xf32> to vector<8x32xf32>
    %19 = arith.addf %15, %18 : vector<8x32xf32>
    %c0_15 = arith.constant 0 : index
    %c0_16 = arith.constant 0 : index
    %c0_17 = arith.constant 0 : index
    %20 = vector.load %arg7[%c0_15, %c0_16, %c0_17] : memref<1x32x32xbf16, #tpu.memory_space<vmem>>, vector<1x32x32xbf16>
    %21 = vector.shape_cast %20 : vector<1x32x32xbf16> to vector<32x32xbf16>
    %cst_18 = arith.constant dense<0.000000e+00> : vector<8x32xf32>
    %22 = tpu.matmul %12, %21, %cst_18 {dimension_numbers = #tpu.dot_dimension_numbers<[1], [0], [0], [1], [0, 0, 1, 1], [], []>} : vector<8x32xbf16>, vector<32x32xbf16>, vector<8x32xf32> -> vector<8x32xf32>
    %c0_19 = arith.constant 0 : index
    %c0_20 = arith.constant 0 : index
    %c0_21 = arith.constant 0 : index
    %23 = vector.load %arg8[%c0_19, %c0_20, %c0_21] : memref<1x1x32xf32, #tpu.memory_space<vmem>>, vector<1x1x32xf32>
    %24 = vector.shape_cast %23 : vector<1x1x32xf32> to vector<1x32xf32>
    %25 = vector.broadcast %24 : vector<1x32xf32> to vector<8x32xf32>
    %26 = arith.addf %22, %25 : vector<8x32xf32>
    %c0_22 = arith.constant 0 : index
    %c0_23 = arith.constant 0 : index
    %c0_24 = arith.constant 0 : index
    %27 = vector.load %arg9[%c0_22, %c0_23, %c0_24] : memref<1x32x32xbf16, #tpu.memory_space<vmem>>, vector<1x32x32xbf16>
    %28 = vector.shape_cast %27 : vector<1x32x32xbf16> to vector<32x32xbf16>
    %cst_25 = arith.constant dense<0.000000e+00> : vector<8x32xf32>
    %29 = tpu.matmul %12, %28, %cst_25 {dimension_numbers = #tpu.dot_dimension_numbers<[1], [0], [0], [1], [0, 0, 1, 1], [], []>} : vector<8x32xbf16>, vector<32x32xbf16>, vector<8x32xf32> -> vector<8x32xf32>
    %c0_26 = arith.constant 0 : index
    %c0_27 = arith.constant 0 : index
    %c0_28 = arith.constant 0 : index
    %30 = vector.load %arg10[%c0_26, %c0_27, %c0_28] : memref<1x1x32xf32, #tpu.memory_space<vmem>>, vector<1x1x32xf32>
    %31 = vector.shape_cast %30 : vector<1x1x32xf32> to vector<1x32xf32>
    %32 = vector.broadcast %31 : vector<1x32xf32> to vector<8x32xf32>
    %33 = arith.addf %29, %32 : vector<8x32xf32>
    %34 = arith.truncf %19 : vector<8x32xf32> to vector<8x32xbf16>
    %35 = arith.truncf %26 : vector<8x32xf32> to vector<8x32xbf16>
    %36 = arith.truncf %33 : vector<8x32xf32> to vector<8x32xbf16>
    %37 = vector.extract_strided_slice %34 {offsets = [0, 0], sizes = [8, 8], strides = [1, 1]} : vector<8x32xbf16> to vector<8x8xbf16>
    %38 = vector.extract_strided_slice %34 {offsets = [0, 8], sizes = [8, 8], strides = [1, 1]} : vector<8x32xbf16> to vector<8x8xbf16>
    %39 = vector.extract_strided_slice %34 {offsets = [0, 16], sizes = [8, 8], strides = [1, 1]} : vector<8x32xbf16> to vector<8x8xbf16>
    %40 = vector.extract_strided_slice %34 {offsets = [0, 24], sizes = [8, 8], strides = [1, 1]} : vector<8x32xbf16> to vector<8x8xbf16>
    %41 = vector.shape_cast %37 : vector<8x8xbf16> to vector<1x8x8xbf16>
    %42 = vector.shape_cast %38 : vector<8x8xbf16> to vector<1x8x8xbf16>
    %43 = vector.shape_cast %39 : vector<8x8xbf16> to vector<1x8x8xbf16>
    %44 = vector.shape_cast %40 : vector<8x8xbf16> to vector<1x8x8xbf16>
    %45 = tpu.concatenate %41, %42, %43, %44 in 0 : vector<1x8x8xbf16>, vector<1x8x8xbf16>, vector<1x8x8xbf16>, vector<1x8x8xbf16> -> vector<4x8x8xbf16>
    %46 = vector.extract_strided_slice %35 {offsets = [0, 0], sizes = [8, 8], strides = [1, 1]} : vector<8x32xbf16> to vector<8x8xbf16>
    %47 = vector.extract_strided_slice %35 {offsets = [0, 8], sizes = [8, 8], strides = [1, 1]} : vector<8x32xbf16> to vector<8x8xbf16>
    %48 = vector.extract_strided_slice %35 {offsets = [0, 16], sizes = [8, 8], strides = [1, 1]} : vector<8x32xbf16> to vector<8x8xbf16>
    %49 = vector.extract_strided_slice %35 {offsets = [0, 24], sizes = [8, 8], strides = [1, 1]} : vector<8x32xbf16> to vector<8x8xbf16>
    %50 = vector.shape_cast %46 : vector<8x8xbf16> to vector<1x8x8xbf16>
    %51 = vector.shape_cast %47 : vector<8x8xbf16> to vector<1x8x8xbf16>
    %52 = vector.shape_cast %48 : vector<8x8xbf16> to vector<1x8x8xbf16>
    %53 = vector.shape_cast %49 : vector<8x8xbf16> to vector<1x8x8xbf16>
    %54 = tpu.concatenate %50, %51, %52, %53 in 0 : vector<1x8x8xbf16>, vector<1x8x8xbf16>, vector<1x8x8xbf16>, vector<1x8x8xbf16> -> vector<4x8x8xbf16>
    %55 = vector.extract_strided_slice %36 {offsets = [0, 0], sizes = [8, 8], strides = [1, 1]} : vector<8x32xbf16> to vector<8x8xbf16>
    %56 = vector.extract_strided_slice %36 {offsets = [0, 8], sizes = [8, 8], strides = [1, 1]} : vector<8x32xbf16> to vector<8x8xbf16>
    %57 = vector.extract_strided_slice %36 {offsets = [0, 16], sizes = [8, 8], strides = [1, 1]} : vector<8x32xbf16> to vector<8x8xbf16>
    %58 = vector.extract_strided_slice %36 {offsets = [0, 24], sizes = [8, 8], strides = [1, 1]} : vector<8x32xbf16> to vector<8x8xbf16>
    %59 = vector.shape_cast %55 : vector<8x8xbf16> to vector<1x8x8xbf16>
    %60 = vector.shape_cast %56 : vector<8x8xbf16> to vector<1x8x8xbf16>
    %61 = vector.shape_cast %57 : vector<8x8xbf16> to vector<1x8x8xbf16>
    %62 = vector.shape_cast %58 : vector<8x8xbf16> to vector<1x8x8xbf16>
    %63 = tpu.concatenate %59, %60, %61, %62 in 0 : vector<1x8x8xbf16>, vector<1x8x8xbf16>, vector<1x8x8xbf16>, vector<1x8x8xbf16> -> vector<4x8x8xbf16>
    "tpu.trace_start"() <{level = 10 : i32, message = "hqd,hkd->hqk"}> : () -> ()
    %cst_29 = arith.constant dense<0.000000e+00> : vector<4x8x8xf32>
    %64 = tpu.matmul %45, %54, %cst_29 {dimension_numbers = #tpu.dot_dimension_numbers<[2], [2], [1], [1], [0, 0, 0, 1, 1, 1], [0], [0]>} : vector<4x8x8xbf16>, vector<4x8x8xbf16>, vector<4x8x8xf32> -> vector<4x8x8xf32>
    "tpu.trace_stop"() : () -> ()
    %65 = tpu.iota {dimensions = array<i32: 0>} : vector<8x8xi32>
    %66 = tpu.iota {dimensions = array<i32: 1>} : vector<8x8xi32>
    %67 = arith.cmpi sle, %66, %65 : vector<8x8xi32>
    %cst_30 = arith.constant 0xFF800000 : f32
    %68 = vector.shape_cast %67 : vector<8x8xi1> to vector<1x8x8xi1>
    %69 = vector.broadcast %68 : vector<1x8x8xi1> to vector<4x8x8xi1>
    %70 = vector.broadcast %cst_30 : f32 to vector<4x8x8xf32>
    %71 = arith.select %69, %64, %70 : vector<4x8x8xi1>, vector<4x8x8xf32>
    %cst_31 = arith.constant dense<0xFF800000> : vector<4x8xf32>
    %72 = vector.multi_reduction <maximumf>, %71, %cst_31 [2] : vector<4x8x8xf32> to vector<4x8xf32>
    %73 = vector.shape_cast %72 : vector<4x8xf32> to vector<4x8x1xf32>
    %74 = vector.broadcast %73 : vector<4x8x1xf32> to vector<4x8x8xf32>
    %75 = arith.subf %71, %74 : vector<4x8x8xf32>
    %76 = math.exp %75 : vector<4x8x8xf32>
    %cst_32 = arith.constant dense<0.000000e+00> : vector<4x8xf32>
    %77 = vector.multi_reduction <add>, %76, %cst_32 [2] : vector<4x8x8xf32> to vector<4x8xf32>
    %78 = vector.shape_cast %77 : vector<4x8xf32> to vector<4x8x1xf32>
    %79 = tpu.reciprocal %78 {approx = true} : vector<4x8x1xf32> -> vector<4x8x1xf32>
    %80 = vector.broadcast %79 : vector<4x8x1xf32> to vector<4x8x8xf32>
    %81 = arith.mulf %76, %80 : vector<4x8x8xf32>
    %82 = arith.truncf %81 : vector<4x8x8xf32> to vector<4x8x8xbf16>
    "tpu.trace_start"() <{level = 10 : i32, message = "hqk,hkd->hqd"}> : () -> ()
    %cst_33 = arith.constant dense<0.000000e+00> : vector<4x8x8xf32>
    %83 = tpu.matmul %82, %63, %cst_33 {dimension_numbers = #tpu.dot_dimension_numbers<[2], [1], [1], [2], [0, 0, 0, 1, 1, 2], [0], [0]>} : vector<4x8x8xbf16>, vector<4x8x8xbf16>, vector<4x8x8xf32> -> vector<4x8x8xf32>
    "tpu.trace_stop"() : () -> ()
    %84 = vector.extract_strided_slice %83 {offsets = [0, 0, 0], sizes = [1, 8, 8], strides = [1, 1, 1]} : vector<4x8x8xf32> to vector<1x8x8xf32>
    %85 = vector.shape_cast %84 : vector<1x8x8xf32> to vector<8x8xf32>
    %86 = vector.extract_strided_slice %83 {offsets = [1, 0, 0], sizes = [1, 8, 8], strides = [1, 1, 1]} : vector<4x8x8xf32> to vector<1x8x8xf32>
    %87 = vector.shape_cast %86 : vector<1x8x8xf32> to vector<8x8xf32>
    %88 = vector.extract_strided_slice %83 {offsets = [2, 0, 0], sizes = [1, 8, 8], strides = [1, 1, 1]} : vector<4x8x8xf32> to vector<1x8x8xf32>
    %89 = vector.shape_cast %88 : vector<1x8x8xf32> to vector<8x8xf32>
    %90 = vector.extract_strided_slice %83 {offsets = [3, 0, 0], sizes = [1, 8, 8], strides = [1, 1, 1]} : vector<4x8x8xf32> to vector<1x8x8xf32>
    %91 = vector.shape_cast %90 : vector<1x8x8xf32> to vector<8x8xf32>
    %92 = tpu.concatenate %85, %87, %89, %91 in 1 : vector<8x8xf32>, vector<8x8xf32>, vector<8x8xf32>, vector<8x8xf32> -> vector<8x32xf32>
    %93 = arith.truncf %92 : vector<8x32xf32> to vector<8x32xbf16>
    %c0_34 = arith.constant 0 : index
    %c0_35 = arith.constant 0 : index
    %c0_36 = arith.constant 0 : index
    %94 = vector.load %arg11[%c0_34, %c0_35, %c0_36] : memref<1x32x32xbf16, #tpu.memory_space<vmem>>, vector<1x32x32xbf16>
    %95 = vector.shape_cast %94 : vector<1x32x32xbf16> to vector<32x32xbf16>
    %cst_37 = arith.constant dense<0.000000e+00> : vector<8x32xf32>
    %96 = tpu.matmul %93, %95, %cst_37 {dimension_numbers = #tpu.dot_dimension_numbers<[1], [0], [0], [1], [0, 0, 1, 1], [], []>} : vector<8x32xbf16>, vector<32x32xbf16>, vector<8x32xf32> -> vector<8x32xf32>
    %c0_38 = arith.constant 0 : index
    %c0_39 = arith.constant 0 : index
    %c0_40 = arith.constant 0 : index
    %97 = vector.load %arg12[%c0_38, %c0_39, %c0_40] : memref<1x1x32xf32, #tpu.memory_space<vmem>>, vector<1x1x32xf32>
    %98 = vector.shape_cast %97 : vector<1x1x32xf32> to vector<1x32xf32>
    %99 = vector.broadcast %98 : vector<1x32xf32> to vector<8x32xf32>
    %100 = arith.addf %96, %99 : vector<8x32xf32>
    %101 = arith.truncf %100 : vector<8x32xf32> to vector<8x32xbf16>
    %c0_41 = arith.constant 0 : index
    %c0_42 = arith.constant 0 : index
    %c0_43 = arith.constant 0 : index
    %102 = vector.load %arg13[%c0_41, %c0_42, %c0_43] : memref<1x32x64xbf16, #tpu.memory_space<vmem>>, vector<1x32x64xbf16>
    %103 = vector.shape_cast %102 : vector<1x32x64xbf16> to vector<32x64xbf16>
    %cst_44 = arith.constant dense<0.000000e+00> : vector<8x64xf32>
    %104 = tpu.matmul %101, %103, %cst_44 {dimension_numbers = #tpu.dot_dimension_numbers<[1], [0], [0], [1], [0, 0, 1, 1], [], []>} : vector<8x32xbf16>, vector<32x64xbf16>, vector<8x64xf32> -> vector<8x64xf32>
    %c0_45 = arith.constant 0 : index
    %c0_46 = arith.constant 0 : index
    %c0_47 = arith.constant 0 : index
    %105 = vector.load %arg14[%c0_45, %c0_46, %c0_47] : memref<1x1x64xf32, #tpu.memory_space<vmem>>, vector<1x1x64xf32>
    %106 = vector.shape_cast %105 : vector<1x1x64xf32> to vector<1x64xf32>
    %107 = vector.broadcast %106 : vector<1x64xf32> to vector<8x64xf32>
    %108 = arith.addf %104, %107 : vector<8x64xf32>
    %c0_48 = arith.constant 0 : index
    %c0_49 = arith.constant 0 : index
    %c0_50 = arith.constant 0 : index
    %109 = vector.load %arg15[%c0_48, %c0_49, %c0_50] : memref<1x32x64xbf16, #tpu.memory_space<vmem>>, vector<1x32x64xbf16>
    %110 = vector.shape_cast %109 : vector<1x32x64xbf16> to vector<32x64xbf16>
    %cst_51 = arith.constant dense<0.000000e+00> : vector<8x64xf32>
    %111 = tpu.matmul %101, %110, %cst_51 {dimension_numbers = #tpu.dot_dimension_numbers<[1], [0], [0], [1], [0, 0, 1, 1], [], []>} : vector<8x32xbf16>, vector<32x64xbf16>, vector<8x64xf32> -> vector<8x64xf32>
    %c0_52 = arith.constant 0 : index
    %c0_53 = arith.constant 0 : index
    %c0_54 = arith.constant 0 : index
    %112 = vector.load %arg16[%c0_52, %c0_53, %c0_54] : memref<1x1x64xf32, #tpu.memory_space<vmem>>, vector<1x1x64xf32>
    %113 = vector.shape_cast %112 : vector<1x1x64xf32> to vector<1x64xf32>
    %114 = vector.broadcast %113 : vector<1x64xf32> to vector<8x64xf32>
    %115 = arith.addf %111, %114 : vector<8x64xf32>
    %116 = arith.negf %115 : vector<8x64xf32>
    %117 = math.exp %116 : vector<8x64xf32>
    %cst_55 = arith.constant 1.000000e+00 : f32
    %118 = vector.broadcast %cst_55 : f32 to vector<8x64xf32>
    %119 = arith.addf %118, %117 : vector<8x64xf32>
    %120 = arith.divf %118, %119 : vector<8x64xf32>
    %121 = arith.mulf %115, %120 : vector<8x64xf32>
    %122 = arith.mulf %121, %108 : vector<8x64xf32>
    %123 = arith.truncf %122 : vector<8x64xf32> to vector<8x64xbf16>
    %c0_56 = arith.constant 0 : index
    %c0_57 = arith.constant 0 : index
    %c0_58 = arith.constant 0 : index
    %124 = vector.load %arg17[%c0_56, %c0_57, %c0_58] : memref<1x64x32xbf16, #tpu.memory_space<vmem>>, vector<1x64x32xbf16>
    %125 = vector.shape_cast %124 : vector<1x64x32xbf16> to vector<64x32xbf16>
    %cst_59 = arith.constant dense<0.000000e+00> : vector<8x32xf32>
    %126 = tpu.matmul %123, %125, %cst_59 {dimension_numbers = #tpu.dot_dimension_numbers<[1], [0], [0], [1], [0, 0, 1, 1], [], []>} : vector<8x64xbf16>, vector<64x32xbf16>, vector<8x32xf32> -> vector<8x32xf32>
    %c0_60 = arith.constant 0 : index
    %c0_61 = arith.constant 0 : index
    %c0_62 = arith.constant 0 : index
    %127 = vector.load %arg18[%c0_60, %c0_61, %c0_62] : memref<1x1x32xf32, #tpu.memory_space<vmem>>, vector<1x1x32xf32>
    %128 = vector.shape_cast %127 : vector<1x1x32xf32> to vector<1x32xf32>
    %129 = vector.broadcast %128 : vector<1x32xf32> to vector<8x32xf32>
    %130 = arith.addf %126, %129 : vector<8x32xf32>
    %c0_63 = arith.constant 0 : index
    %c0_64 = arith.constant 0 : index
    %131 = vector.load %arg20[%c0_63, %c0_64] : memref<8x32xf32, #tpu.memory_space<vmem>>, vector<8x32xf32>
    tpu.vector_store %arg20[%c0_63, %c0_64], %130 {strides = array<i32>} : memref<8x32xf32, #tpu.memory_space<vmem>>, vector<8x32xf32>,
    %c1_i32 = arith.constant 1 : i32
    %132 = arith.cmpi eq, %arg1, %c1_i32 : i32
    %133 = arith.extui %132 : i1 to i32
    %c0_i32_65 = arith.constant 0 : i32
    %134 = arith.cmpi ne, %133, %c0_i32_65 : i32
    scf.if %134 {
      %c0_66 = arith.constant 0 : index
      %c0_67 = arith.constant 0 : index
      %c0_68 = arith.constant 0 : index
      %135 = vector.load %arg19[%c0_66, %c0_67, %c0_68] : memref<1x8x32xf32, #tpu.memory_space<vmem>>, vector<1x8x32xf32>
      %136 = vector.shape_cast %135 : vector<1x8x32xf32> to vector<8x32xf32>
      %137 = vector.shape_cast %130 : vector<8x32xf32> to vector<1x8x32xf32>
      tpu.vector_store %arg19[%c0_66, %c0_67, %c0_68], %137 {strides = array<i32>} : memref<1x8x32xf32, #tpu.memory_space<vmem>>, vector<1x8x32xf32>,
    } else {
    }
    return
  }
  func.func @transform_0(%arg0: i32, %arg1: i32) -> (i32, i32, i32) {
    %c0_i32 = arith.constant 0 : i32
    %c0_i32_0 = arith.constant 0 : i32
    %c0_i32_1 = arith.constant 0 : i32
    return %arg0, %c0_i32, %c0_i32_0 : i32, i32, i32
  }
  func.func @transform_1(%arg0: i32, %arg1: i32) -> (i32, i32, i32) {
    %c0_i32 = arith.constant 0 : i32
    %c0_i32_0 = arith.constant 0 : i32
    %c0_i32_1 = arith.constant 0 : i32
    return %arg1, %c0_i32, %c0_i32_0 : i32, i32, i32
  }
  func.func @transform_2(%arg0: i32, %arg1: i32) -> (i32, i32, i32) {
    %c0_i32 = arith.constant 0 : i32
    %c0_i32_0 = arith.constant 0 : i32
    %c0_i32_1 = arith.constant 0 : i32
    return %arg1, %c0_i32, %c0_i32_0 : i32, i32, i32
  }
  func.func @transform_3(%arg0: i32, %arg1: i32) -> (i32, i32, i32) {
    %c0_i32 = arith.constant 0 : i32
    %c0_i32_0 = arith.constant 0 : i32
    %c0_i32_1 = arith.constant 0 : i32
    return %arg1, %c0_i32, %c0_i32_0 : i32, i32, i32
  }
  func.func @transform_4(%arg0: i32, %arg1: i32) -> (i32, i32, i32) {
    %c0_i32 = arith.constant 0 : i32
    %c0_i32_0 = arith.constant 0 : i32
    %c0_i32_1 = arith.constant 0 : i32
    return %arg1, %c0_i32, %c0_i32_0 : i32, i32, i32
  }
  func.func @transform_5(%arg0: i32, %arg1: i32) -> (i32, i32, i32) {
    %c0_i32 = arith.constant 0 : i32
    %c0_i32_0 = arith.constant 0 : i32
    %c0_i32_1 = arith.constant 0 : i32
    return %arg1, %c0_i32, %c0_i32_0 : i32, i32, i32
  }
  func.func @transform_6(%arg0: i32, %arg1: i32) -> (i32, i32, i32) {
    %c0_i32 = arith.constant 0 : i32
    %c0_i32_0 = arith.constant 0 : i32
    %c0_i32_1 = arith.constant 0 : i32
    return %arg1, %c0_i32, %c0_i32_0 : i32, i32, i32
  }
  func.func @transform_7(%arg0: i32, %arg1: i32) -> (i32, i32, i32) {
    %c0_i32 = arith.constant 0 : i32
    %c0_i32_0 = arith.constant 0 : i32
    %c0_i32_1 = arith.constant 0 : i32
    return %arg1, %c0_i32, %c0_i32_0 : i32, i32, i32
  }
  func.func @transform_8(%arg0: i32, %arg1: i32) -> (i32, i32, i32) {
    %c0_i32 = arith.constant 0 : i32
    %c0_i32_0 = arith.constant 0 : i32
    %c0_i32_1 = arith.constant 0 : i32
    return %arg1, %c0_i32, %c0_i32_0 : i32, i32, i32
  }
  func.func @transform_9(%arg0: i32, %arg1: i32) -> (i32, i32, i32) {
    %c0_i32 = arith.constant 0 : i32
    %c0_i32_0 = arith.constant 0 : i32
    %c0_i32_1 = arith.constant 0 : i32
    return %arg1, %c0_i32, %c0_i32_0 : i32, i32, i32
  }
  func.func @transform_10(%arg0: i32, %arg1: i32) -> (i32, i32, i32) {
    %c0_i32 = arith.constant 0 : i32
    %c0_i32_0 = arith.constant 0 : i32
    %c0_i32_1 = arith.constant 0 : i32
    return %arg1, %c0_i32, %c0_i32_0 : i32, i32, i32
  }
  func.func @transform_11(%arg0: i32, %arg1: i32) -> (i32, i32, i32) {
    %c0_i32 = arith.constant 0 : i32
    %c0_i32_0 = arith.constant 0 : i32
    %c0_i32_1 = arith.constant 0 : i32
    return %arg1, %c0_i32, %c0_i32_0 : i32, i32, i32
  }
  func.func @transform_12(%arg0: i32, %arg1: i32) -> (i32, i32, i32) {
    %c0_i32 = arith.constant 0 : i32
    %c0_i32_0 = arith.constant 0 : i32
    %c0_i32_1 = arith.constant 0 : i32
    return %arg1, %c0_i32, %c0_i32_0 : i32, i32, i32
  }
  func.func @transform_13(%arg0: i32, %arg1: i32) -> (i32, i32, i32) {
    %c0_i32 = arith.constant 0 : i32
    %c0_i32_0 = arith.constant 0 : i32
    %c0_i32_1 = arith.constant 0 : i32
    return %arg1, %c0_i32, %c0_i32_0 : i32, i32, i32
  }
  func.func @transform_14(%arg0: i32, %arg1: i32) -> (i32, i32, i32) {
    %c0_i32 = arith.constant 0 : i32
    %c0_i32_0 = arith.constant 0 : i32
    %c0_i32_1 = arith.constant 0 : i32
    return %arg1, %c0_i32, %c0_i32_0 : i32, i32, i32
  }
  func.func @transform_15(%arg0: i32, %arg1: i32) -> (i32, i32, i32) {
    %c0_i32 = arith.constant 0 : i32
    %c0_i32_0 = arith.constant 0 : i32
    %c0_i32_1 = arith.constant 0 : i32
    return %arg1, %c0_i32, %c0_i32_0 : i32, i32, i32
  }
  func.func @transform_16(%arg0: i32, %arg1: i32) -> (i32, i32, i32) {
    %c0_i32 = arith.constant 0 : i32
    %c0_i32_0 = arith.constant 0 : i32
    %c0_i32_1 = arith.constant 0 : i32
    return %arg1, %c0_i32, %c0_i32_0 : i32, i32, i32
  }
  func.func @transform_17(%arg0: i32, %arg1: i32) -> (i32, i32, i32) {
    %c0_i32 = arith.constant 0 : i32
    %c0_i32_0 = arith.constant 0 : i32
    %c0_i32_1 = arith.constant 0 : i32
    return %arg0, %c0_i32, %c0_i32_0 : i32, i32, i32
  }
}

</mosaic_0001>

<bundles_post_ra>
// kernel: tpu_custom_call.1
= control target key start
LH: loop header
LB: loop body
LE: loop exit
PB: predicated region body
PF: predicated region fallthrough
CT: control target
= control target key end

     0   :  { %s3739_s0 = inlined_call_operand.hbm [shape: f32[2,8,32], index: 0, kind: input, shape index: {}]   ;;  %s3740_s1 = inlined_call_operand.vmem [shape: bf16[2,32,32], index: 1, kind: input, shape index: {}]   ;;  %s3741_s2 = inlined_call_operand.vmem [shape: f32[2,1,32], index: 2, kind: input, shape index: {}]   ;;  %s3742_s3 = inlined_call_operand.vmem [shape: bf16[2,32,32], index: 3, kind: input, shape index: {}]   ;;  %s3743_s4 = inlined_call_operand.vmem [shape: f32[2,1,32], index: 4, kind: input, shape index: {}]   ;;  %s3744_s5 = inlined_call_operand.vmem [shape: bf16[2,32,32], index: 5, kind: input, shape index: {}]   ;;  %s3745_s6 = inlined_call_operand.vmem [shape: f32[2,1,32], index: 6, kind: input, shape index: {}]   ;;  %s3746_s7 = inlined_call_operand.hbm [shape: bf16[2,32,32], index: 7, kind: input, shape index: {}]   ;;  %s3747_s8 = inlined_call_operand.vmem [shape: f32[2,1,32], index: 8, kind: input, shape index: {}]   ;;  %s3748_s9 = inlined_call_operand.hbm [shape: bf16[2,32,32], index: 9, kind: input, shape index: {}]   ;;  %s3749_s10 = inlined_call_operand.vmem [shape: f32[2,1,32], index: 10, kind: input, shape index: {}]   ;;  %s3750_s11 = inlined_call_operand.hbm [shape: bf16[2,32,64], index: 11, kind: input, shape index: {}]   ;;  %s3751_s12 = inlined_call_operand.vmem [shape: f32[2,1,64], index: 12, kind: input, shape index: {}]   ;;  %s3752_s13 = inlined_call_operand.hbm [shape: bf16[2,32,64], index: 13, kind: input, shape index: {}]   ;;  %s3753_s14 = inlined_call_operand.vmem [shape: f32[2,1,64], index: 14, kind: input, shape index: {}]   ;;  %s3754_s15 = inlined_call_operand.vmem [shape: bf16[2,64,32], index: 15, kind: input, shape index: {}]   ;;  %s3755_s16 = inlined_call_operand.vmem [shape: f32[2,1,32], index: 16, kind: input, shape index: {}]   ;;  %s3756_s17 = inlined_call_operand.hbm [shape: f32[2,8,32], index: 17, kind: output, shape index: {}]  }
   0x1   :  { %3788 = sst [smem:[#allocation34_spill]] %s3739_s0 }
   0x2   :  { %3789 = sst [smem:[#allocation35_spill]] %s3740_s1 }
   0x3   :  { %3790 = sst [smem:[#allocation36_spill]] %s3741_s2 }
   0x4   :  { %3791 = sst [smem:[#allocation37_spill]] %s3742_s3 }
   0x5   :  { %3792 = sst [smem:[#allocation38_spill]] %s3743_s4 }
   0x6   :  { %3793 = sst [smem:[#allocation39_spill]] %s3744_s5 }
   0x7   :  { %3794 = sst [smem:[#allocation40_spill]] %s3745_s6 }
   0x8   :  { %3795 = sst [smem:[#allocation41_spill]] %s3746_s7 }
   0x9   :  { %3796 = sst [smem:[#allocation42_spill]] %s3747_s8 }
   0xa   :  { %3797 = sst [smem:[#allocation43_spill]] %s3748_s9 }
   0xb   :  { %3798 = sst [smem:[#allocation44_spill]] %s3749_s10 }
   0xc   :  { %3799 = sst [smem:[#allocation45_spill]] %s3750_s11 }
   0xd   :  { %3800 = sst [smem:[#allocation46_spill]] %s3751_s12 }
   0xe   :  { %3801 = sst [smem:[#allocation47_spill]] %s3752_s13 }
   0xf   :  { %3802 = sst [smem:[#allocation48_spill]] %s3753_s14 }
  0x10   :  { %3803 = sst [smem:[#allocation49_spill]] %s3754_s15 }
  0x11   :  { %3804 = sst [smem:[#allocation50_spill]] %s3755_s16 }
  0x12   :  { %3805 = sst [smem:[#allocation51_spill]] %s3756_s17 }
  0x13   :  { %22 = vsyncpa [#allocation4], 0 }
  0x14   :  { %24 = vsyncpa [#allocation4 + $0x1], 0 }
  0x15   :  { %25 = vsyncpa [#allocation7], 0 }
  0x16   :  { %27 = vsyncpa [#allocation7 + $0x1], 0 }
  0x17   :  { %28 = vsyncpa [#allocation10], 0 }
  0x18   :  { %30 = vsyncpa [#allocation10 + $0x1], 0 }
  0x19   :  { %31 = vsyncpa [#allocation5], 0 }
  0x1a   :  { %33 = vsyncpa [#allocation5 + $0x1], 0  ;;  %s3064_s24 = smov 0   ;;  %s3066_s25 = smov 0  }
  0x1b   :  { %s3068_s26 = smov 0   ;;  %s3070_s27 = smov 0  }
  0x1c   :  { %s3072_s28 = smov 0   ;;  %s3074_s29 = smov 0  }
  0x1d   :  { %s3076_s0 = smov 0   ;;  %s3078_s30 = smov 0  }
  0x1e   :  { %s3080_s18 = smov 0   ;;  %s3082_s19 = smov 0  }
  0x1f   :  { %s3084_s1 = smov 0  }
  0x20 LB: > { %3806 = sst [smem:[#allocation17_spill]] %s2920_s25  ;;  %p3760_p0 = scmp.eq.s32.totalorder %s2956_s1, 0  ;;  %s2956_s1 = sphi %s3084_s1, %s39_s1   ;;  %s2952_s19 = sphi %s3082_s19, %s3902_s19   ;;  %s2948_s18 = sphi %s3080_s18, %s3901_s18   ;;  %s2944_s30 = sphi %s3078_s30, %s3900_s30   ;;  %s2940_s0 = sphi %s3076_s0, %s3899_s0   ;;  %s2936_s29 = sphi %s3074_s29, %s3898_s29   ;;  %s2932_s28 = sphi %s3072_s28, %s3897_s28   ;;  %s2928_s27 = sphi %s3070_s27, %s3896_s27   ;;  %s2924_s26 = sphi %s3068_s26, %s3895_s26   ;;  %s2920_s25 = sphi %s3066_s25, %s3894_s25   ;;  %s2916_s24 = sphi %s3064_s24, %s3893_s24  }
  0x21   : > { %3807 = sst [smem:[#allocation18_spill]] %s2924_s26  ;;  %p247_p1 = scmp.ne.s32.totalorder %s2924_s26, %s2920_s25 }
  0x22   : > { %3808 = sst [smem:[#allocation19_spill]] %s2928_s27  ;;  %p3759_p2 = scmp.lt.s32.totalorder %s2956_s1, 4 }
  0x23   : > { %3809 = sst [smem:[#allocation20_spill]] %s2932_s28  ;;  %p249_p3 = por %p247_p1, %p3760_p0 }
  0x24   : > { %3810 = sst [smem:[#allocation21_spill]] %s2936_s29  ;;  %s599_s23 = sand.u32 1, %s2924_s26  }
  0x25   : > { %3811 = sst [smem:[#allocation22_spill]] %s2940_s0  ;;  %s3129_s17 = sshll.u32 %s599_s23, 4 }
  0x26   : > { %3812 = sst [smem:[#allocation23_spill]] %s2944_s30  ;;  %s3132_s30 = sshll.u32 %s2948_s18, 8 }
  0x27   : > { %3813 = sst [smem:[#allocation24_spill]] %s2948_s18  ;;  %s3816_s7 = sld [smem:[#allocation41_spill]] }
  0x28   : > { %3814 = sst [smem:[#allocation25_spill]] %s2952_s19  ;;  %s601_s21 = scalar_lea.vmem [#allocation6], %s3129_s17 }
  0x29   : > { %3815 = sst [smem:[#allocation26_spill]] %s2956_s1  ;;  %s608_s20 = sshll.u32 %s601_s21, 4  ;;  %s3147_s20 = int_to_ptr.vmem [resolvable:$true] %s608_s20 }
  0x2a   : > { %p3143_p4 = pnand %p3759_p2, %p249_p3  ;;  %s3818_s23 = sand.u32 1, %s2956_s1  }
  0x2b   : > { %s3151_s12 = scalar_lea.sflag [#allocation7], %s3818_s23 }
  0x2c   : > { %s3817_s22 = scalar_select %p3143_p4, 1, 0 }
  0x2d   : > { %s3138_s14 = scalar_lea.hbm %s3816_s7, %s3132_s30  ;;  %p3157_p6 = pneg %p3143_p4 }
  0x2e   : > { %s2676_s15 = scalar_lea.hbm %s3138_s14, 256  ;;  %s2681_s8 = scalar_lea.hbm %s3816_s7, 512 }
  0x2f   : > { %p2677_p5 = scmp.ne.s32.totalorder %s3138_s14, %s2676_s15  ;;  %p2682_p9 = scmp.lt.u32.totalorder %s3138_s14, %s3816_s7 }
  0x30   : > { %p2683_p10 = scmp.lt.u32.totalorder %s2681_s8, %s2676_s15  ;;  %p2685_p12 = scmp.lt.u32.totalorder %s2676_s15, %s3138_s14 }
  0x31   : > { %p2679_p7 = pnand %p3157_p6, %p2677_p5 }
  0x32   : > { %p2684_p11 = por %p2683_p10, %p2682_p9 }
  0x33   : > { %p2680_p8 = pneg %p2679_p7 }
  0x34   : > { %p2686_p13 = por %p2685_p12, %p2684_p11 }
  0x36   : > { %p2687_p1 = pnand %p2686_p13, %p2680_p8 }
  0x38   : > { %2690 = shalt.err (!%p2687_p1)
}
  0x39   : > { %s2691_s23 = scalar_lea.vmem %s3147_s20, 256  ;;  %s2958_s10 = smov [#allocation6]  }
  0x3a   : > { %p2692_p3 = scmp.ne.s32.totalorder %s3147_s20, %s2691_s23  ;;  %s2696_s21 = sshll.u32 %s2958_s10, 4  ;;  %s2697_s21 = int_to_ptr.vmem [resolvable:$false] %s2696_s21 }
  0x3b   : > { %s2698_s5 = scalar_lea.vmem %s2697_s21, 512  ;;  %p2699_p2 = scmp.lt.s32.totalorder %s3147_s20, %s2697_s21 }
  0x3c   : > { %p2694_p5 = pnand %p2692_p3, %p3157_p6  ;;  %p2700_p0 = scmp.lt.s32.totalorder %s2698_s5, %s2691_s23 }
  0x3e   : > { %p2695_p7 = pneg %p2694_p5  ;;  %p2701_p9 = por %p2700_p0, %p2699_p2 }
  0x40   : > { %p2702_p10 = pnand %p2701_p9, %p2695_p7 }
  0x42   : > { %2705 = shalt.err (!%p2702_p10)
}
  0x43   : > { %s3761_s6 = smov 64   ;;  %s3763_s8 = smov 4  }
  0x44   : > { %2524 = dma.hbm_to_vmem [thread:$0]  (!%p3143_p4), %s3138_s14, 256, %s3147_s20, %s3151_s12, %s3761_s6, %s3761_s6, %s3763_s8  }
  0x45   : > { %p2276_p0 = scmp.ge.s32.totalorder %s2956_s1, 1  ;;  %p717_p2 = scmp.lt.s32.totalorder %s2956_s1, 5 }
  0x46   : > { %s3821_s11 = sld [smem:[#allocation45_spill]]  ;;  %s655_s5 = scalar_lea.vmem [#allocation9], %s3129_s17 }
  0x47   : > { %p3186_p8 = pnand %p2276_p0, %p717_p2  ;;  %s662_s7 = sshll.u32 %s655_s5, 4  ;;  %s3197_s7 = int_to_ptr.vmem [resolvable:$true] %s662_s7 }
  0x48   : > { %s3822_s14 = sand.u32 1, %s2956_s1  }
  0x49   : > { %s3820_s15 = scalar_select %p3186_p8, 1, 0 }
  0x4a   : > { %s3201_s20 = scalar_lea.sflag [#allocation10], %s3822_s14 }
  0x4c   : > { %s3194_s21 = scalar_lea.hbm %s3821_s11, %s3132_s30  ;;  %s2711_s10 = scalar_lea.hbm %s3821_s11, 512 }
  0x4d   : > { %s2706_s6 = scalar_lea.hbm %s3194_s21, 256  ;;  %p2712_p1 = scmp.lt.u32.totalorder %s3194_s21, %s3821_s11 }
  0x4e   : > { %p2707_p11 = scmp.ne.s32.totalorder %s3194_s21, %s2706_s6  ;;  %p2713_p3 = scmp.lt.u32.totalorder %s2711_s10, %s2706_s6 }
  0x4f   : > { %p2715_p7 = scmp.lt.u32.totalorder %s2706_s6, %s3194_s21 }
  0x50   : > { %p2709_p12 = pnand %p2707_p11, %p3157_p6  ;;  %p2714_p5 = por %p2713_p3, %p2712_p1 }
  0x52   : > { %p2710_p13 = pneg %p2709_p12  ;;  %p2716_p9 = por %p2715_p7, %p2714_p5 }
  0x54   : > { %p2717_p10 = pnand %p2716_p9, %p2710_p13 }
  0x56   : > { %2720 = shalt.err (!%p2717_p10)
}
  0x57   : > { %s2721_s5 = scalar_lea.vmem %s3197_s7, 256  ;;  %s2961_s8 = smov [#allocation9]  }
  0x58   : > { %p2722_p0 = scmp.ne.s32.totalorder %s3197_s7, %s2721_s5  ;;  %s2726_s14 = sshll.u32 %s2961_s8, 4  ;;  %s2727_s14 = int_to_ptr.vmem [resolvable:$false] %s2726_s14 }
  0x59   : > { %s2728_s3 = scalar_lea.vmem %s2727_s14, 512  ;;  %p2729_p12 = scmp.lt.s32.totalorder %s3197_s7, %s2727_s14 }
  0x5a   : > { %p2724_p2 = pnand %p2722_p0, %p3157_p6  ;;  %p2730_p8 = scmp.lt.s32.totalorder %s2728_s3, %s2721_s5 }
  0x5c   : > { %p2725_p11 = pneg %p2724_p2  ;;  %p2731_p1 = por %p2730_p8, %p2729_p12 }
  0x5e   : > { %p2732_p3 = pnand %p2731_p1, %p2725_p11 }
  0x60   : > { %2735 = shalt.err (!%p2732_p3)
}
  0x61   : > { %s3823_s4 = smov 4   ;;  %s3824_s6 = smov 64  }
  0x62   : > { %2530 = dma.hbm_to_vmem [thread:$0]  (!%p3143_p4), %s3194_s21, 256, %s3197_s7, %s3201_s20, %s3824_s6, %s3824_s6, %s3823_s4  }
  0x63   : > { %s3229_s23 = sadd.s32 4294967295, %s2956_s1   ;;  %s2259_s10 = sadd.s32 4294967294, %s2956_s1  }
  0x64   : > { %3825 = sst [smem:[#allocation27_spill]] %s3229_s23  ;;  %s3826_s5 = sadd.s32 1, %s2948_s18 }
  0x65   : > { %p49_p8 = scmp.ge.s32.totalorder %s3826_s5, 2  ;;  %s51_s8 = sadd.s32 1, %s2952_s19 }
  0x66   : > { %s58_s14 = sadd.s32 1, %s2936_s29  ;;  %p65_p13 = scmp.ne.s32.totalorder %s2936_s29, %s2932_s28 }
  0x67   : > { %s3827_s3 = smov %s3826_s5  ;;  %s3906_s8 = smov (!%p49_p8, %s51_s8), %s2952_s19 }
  0x68   : > { %s3904_s3 = smov (%p49_p8, %s3827_s3), 0  ;;  %p3829_p5 = scmp.eq.s32.totalorder %s2956_s1, 0 }
  0x69   : > { %3828 = sst [smem:[#allocation28_spill]] %s3904_s3  ;;  %p71_p9 = scmp.ne.s32.totalorder %s2932_s28, %s2928_s27 }
  0x6a   : > { %p3248_p7 = por %p3829_p5, %p65_p13  ;;  %p53_p10 = scmp.ge.s32.totalorder %s3906_s8, 2 }
  0x6b   : > { %p72_p0 = scmp.eq.s32.totalorder %s3229_s23, 0  ;;  %s237_s21 = ssub.s32 %s2948_s18, %s3904_s3 }
  0x6c   : > { %p253_p2 = scmp.ne.s32.totalorder %s2920_s25, %s2916_s24  ;;  %s3908_s8 = smov (%p53_p10, %s3906_s8), 0 }
  0x6d   : > { %3831 = sst [smem:[#allocation29_spill]] %s3908_s8  ;;  %p3264_p11 = por %p72_p0, %p71_p9 }
  0x6e   : > { %p238_p12 = scmp.eq.s32.totalorder %s237_s21, 0  ;;  %s55_s11 = ssub.s32 %s2952_s19, %s3908_s8 }
  0x6f   : > { %s3832_s5 = scalar_select %p3264_p11, 1, 0 }
  0x70   : > { %p3270_p1 = por %p253_p2, %p72_p0  ;;  %p56_p3 = scmp.eq.s32.totalorder %s55_s11, 0 }
  0x71   : > { %p511_p8 = scmp.eq.s32.totalorder %s3229_s23, 3  ;;  %s3835_s3 = sadd.s32 1, %s2924_s26 }
  0x72   : > { %s3833_s2 = scalar_select %p3270_p1, 1, 0 }
  0x73   : > { %s3278_s24 = scalar_select %p238_p12, %s2924_s26, %s3835_s3  }
  0x74   : > { %3834 = sst [smem:[#allocation30_spill]] %s3833_s2  ;;  %p3286_p5 = por %p511_p8, %p65_p13 }
  0x75   : > { %3836 = sst [smem:[#allocation31_spill]] %s3278_s24  ;;  %p517_p10 = scmp.eq.s32.totalorder %s2259_s10, 3 }
  0x76   : > { %s3281_s18 = scalar_select %p56_p3, %s2936_s29, %s58_s14  }
  0x77   : > { %s3838_s0 = scalar_select %p3286_p5, 1, 0 }
  0x78   : > { %3837 = sst [smem:[#allocation32_spill]] %s3281_s18  ;;  %s537_s25 = sand.u32 1, %s2936_s29  }
  0x79   : > { %s2263_s21 = sshll.u32 %s2952_s19, 7  ;;  %p3295_p0 = por %p517_p10, %p71_p9 }
  0x7a   : > { %s2262_s11 = sshll.u32 %s537_s25, 3  ;;  %s3841_s3 = sld [smem:[#allocation34_spill]] }
  0x7b   : > { %s3839_s8 = scalar_select %p3295_p0, 1, 0 }
  0x7c   : > { %p3842_p2 = scmp.lt.s32.totalorder %s2956_s1, 4  ;;  %s541_s14 = scalar_lea.vmem [#allocation3], %s2262_s11 }
  0x7d   : > { %3840 = sst [smem:[#allocation33_spill]] %s3839_s8  ;;  %s548_s19 = sshll.u32 %s541_s14, 4  ;;  %s3312_s19 = int_to_ptr.vmem [resolvable:$true] %s548_s19 }
  0x7e   : > { %p3308_p13 = pnand %p3842_p2, %p3248_p7  ;;  %s538_s18 = scalar_lea.sflag [#allocation4], %s537_s25 }
  0x80   : > { %s3302_s24 = scalar_lea.hbm %s3841_s3, %s2263_s21  ;;  %p2738_p12 = pneg %p3308_p13 }
  0x81   : > { %s2736_s2 = scalar_lea.hbm %s3302_s24, 128  ;;  %s2741_s21 = scalar_lea.hbm %s3841_s3, 256 }
  0x82   : > { %p2737_p9 = scmp.ne.s32.totalorder %s3302_s24, %s2736_s2  ;;  %p2742_p7 = scmp.lt.u32.totalorder %s3302_s24, %s3841_s3 }
  0x83   : > { %p2743_p10 = scmp.lt.u32.totalorder %s2741_s21, %s2736_s2  ;;  %p2745_p0 = scmp.lt.u32.totalorder %s2736_s2, %s3302_s24 }
  0x84   : > { %p2739_p3 = pnand %p2738_p12, %p2737_p9 }
  0x85   : > { %p2744_p2 = por %p2743_p10, %p2742_p7 }
  0x86   : > { %p2740_p8 = pneg %p2739_p3 }
  0x87   : > { %p2746_p5 = por %p2745_p0, %p2744_p2 }
  0x89   : > { %p2747_p1 = pnand %p2746_p5, %p2740_p8 }
  0x8b   : > { %2750 = shalt.err (!%p2747_p1)
}
  0x8c   : > { %s2751_s25 = scalar_lea.vmem %s3312_s19, 128  ;;  %s2962_s11 = smov [#allocation3]  }
  0x8d   : > { %p2752_p9 = scmp.ne.s32.totalorder %s3312_s19, %s2751_s25  ;;  %s2756_s14 = sshll.u32 %s2962_s11, 4  ;;  %s2757_s14 = int_to_ptr.vmem [resolvable:$false] %s2756_s14 }
  0x8e   : > { %s2758_s26 = scalar_lea.vmem %s2757_s14, 256  ;;  %p2759_p4 = scmp.lt.s32.totalorder %s3312_s19, %s2757_s14 }
  0x8f   : > { %p2754_p3 = pnand %p2752_p9, %p2738_p12  ;;  %p2760_p7 = scmp.lt.s32.totalorder %s2758_s26, %s2751_s25 }
  0x91   : > { %p2755_p11 = pneg %p2754_p3  ;;  %p2761_p10 = por %p2760_p7, %p2759_p4 }
  0x93   : > { %p2762_p0 = pnand %p2761_p10, %p2755_p11 }
  0x95   : > { %2765 = shalt.err (!%p2762_p0)
}
  0x96   : > { %2521 = dma.hbm_to_vmem [thread:$0]  (!%p3308_p13), %s3302_s24, 128, %s3312_s19, %s538_s18  }
  0x97   : > { %s3844_s9 = sld [smem:[#allocation43_spill]]  ;;  %s628_s7 = scalar_lea.vmem [#allocation8], %s3129_s17 }
  0x98   : > { %s635_s21 = sshll.u32 %s628_s7, 4  ;;  %s3346_s21 = int_to_ptr.vmem [resolvable:$true] %s635_s21 }
  0x9d   : > { %s3343_s23 = scalar_lea.hbm %s3844_s9, %s3132_s30  ;;  %s2771_s19 = scalar_lea.hbm %s3844_s9, 512 }
  0x9e   : > { %s2766_s10 = scalar_lea.hbm %s3343_s23, 256  ;;  %p2772_p5 = scmp.lt.u32.totalorder %s3343_s23, %s3844_s9 }
  0x9f   : > { %p2767_p4 = scmp.ne.s32.totalorder %s3343_s23, %s2766_s10  ;;  %p2773_p13 = scmp.lt.u32.totalorder %s2771_s19, %s2766_s10 }
  0xa0   : > { %p2775_p8 = scmp.lt.u32.totalorder %s2766_s10, %s3343_s23 }
  0xa1   : > { %p2769_p11 = pnand %p2767_p4, %p3157_p6  ;;  %p2774_p12 = por %p2773_p13, %p2772_p5 }
  0xa3   : > { %p2770_p1 = pneg %p2769_p11  ;;  %p2776_p2 = por %p2775_p8, %p2774_p12 }
  0xa5   : > { %p2777_p9 = pnand %p2776_p2, %p2770_p1 }
  0xa7   : > { %2780 = shalt.err (!%p2777_p9)
}
  0xa8   : > { %s2781_s14 = scalar_lea.vmem %s3346_s21, 256  ;;  %s2963_s26 = smov [#allocation8]  }
  0xa9   : > { %p2782_p3 = scmp.ne.s32.totalorder %s3346_s21, %s2781_s14  ;;  %s2786_s29 = sshll.u32 %s2963_s26, 4  ;;  %s2787_s29 = int_to_ptr.vmem [resolvable:$false] %s2786_s29 }
  0xaa   : > { %s2788_s2 = scalar_lea.vmem %s2787_s29, 512  ;;  %p2789_p0 = scmp.lt.s32.totalorder %s3346_s21, %s2787_s29 }
  0xab   : > { %p2784_p7 = pnand %p2782_p3, %p3157_p6  ;;  %p2790_p4 = scmp.lt.s32.totalorder %s2788_s2, %s2781_s14 }
  0xad   : > { %p2785_p10 = pneg %p2784_p7  ;;  %p2791_p11 = por %p2790_p4, %p2789_p0 }
  0xaf   : > { %p2792_p5 = pnand %p2791_p11, %p2785_p10 }
  0xb1   : > { %2795 = shalt.err (!%p2792_p5)
}
  0xb2   : > { %p3845_p1 = scmp.ne.s32.totalorder %s3817_s22, 0  ;;  %s3846_s13 = sld [smem:[#allocation47_spill]] }
  0xb3   : > { %s682_s18 = scalar_lea.vmem [#allocation11], %s3129_s17 }
  0xb4   : > { %2527 = dma.hbm_to_vmem [thread:$0]  (!%p3845_p1), %s3343_s23, 256, %s3346_s21, %s3151_s12, %s3824_s6, %s3824_s6, %s3823_s4  }
  0xb5   : > { %s689_s19 = sshll.u32 %s682_s18, 4  ;;  %s3380_s19 = int_to_ptr.vmem [resolvable:$true] %s689_s19 }
  0xb8   : > { %s3377_s25 = scalar_lea.hbm %s3846_s13, %s3132_s30  ;;  %s2801_s23 = scalar_lea.hbm %s3846_s13, 512 }
  0xb9   : > { %s2796_s24 = scalar_lea.hbm %s3377_s25, 256  ;;  %p2802_p2 = scmp.lt.u32.totalorder %s3377_s25, %s3846_s13 }
  0xba   : > { %p2797_p13 = scmp.ne.s32.totalorder %s3377_s25, %s2796_s24  ;;  %p2803_p9 = scmp.lt.u32.totalorder %s2801_s23, %s2796_s24 }
  0xbb   : > { %p2805_p7 = scmp.lt.u32.totalorder %s2796_s24, %s3377_s25 }
  0xbc   : > { %p2799_p12 = pnand %p2797_p13, %p3157_p6  ;;  %p2804_p3 = por %p2803_p9, %p2802_p2 }
  0xbe   : > { %p2800_p8 = pneg %p2799_p12  ;;  %p2806_p10 = por %p2805_p7, %p2804_p3 }
  0xc0   : > { %p2807_p0 = pnand %p2806_p10, %p2800_p8 }
  0xc2   : > { %2810 = shalt.err (!%p2807_p0)
}
  0xc3   : > { %s2811_s17 = scalar_lea.vmem %s3380_s19, 256  ;;  %s2964_s14 = smov [#allocation11]  }
  0xc4   : > { %p2812_p4 = scmp.ne.s32.totalorder %s3380_s19, %s2811_s17  ;;  %s2816_s26 = sshll.u32 %s2964_s14, 4  ;;  %s2817_s26 = int_to_ptr.vmem [resolvable:$false] %s2816_s26 }
  0xc5   : > { %s2818_s29 = scalar_lea.vmem %s2817_s26, 512  ;;  %p2819_p13 = scmp.lt.s32.totalorder %s3380_s19, %s2817_s26 }
  0xc6   : > { %p2814_p11 = pnand %p2812_p4, %p3157_p6  ;;  %p2820_p12 = scmp.lt.s32.totalorder %s2818_s29, %s2811_s17 }
  0xc8   : > { %p2815_p5 = pneg %p2814_p11  ;;  %p2821_p2 = por %p2820_p12, %p2819_p13 }
  0xca   : > { %p2822_p9 = pnand %p2821_p2, %p2815_p5 }
  0xcc   : > { %2825 = shalt.err (!%p2822_p9)
}
  0xcd   : > { %2533 = dma.hbm_to_vmem [thread:$0]  (!%p3845_p1), %s3377_s25, 256, %s3380_s19, %s3201_s20, %s3824_s6, %s3824_s6, %s3823_s4  }
  0xce   : > { %p3847_p6 = scmp.ne.s32.totalorder %s3820_s15, 0 }
  0xcf   : > { %s3410_s16 = sand.u32 (!%p3847_p6), 1, %s2932_s28   ;;  %p3848_p8 = scmp.ne.s32.totalorder (!%p3847_p6), %s3832_s5, 0 }
  0xd0   : > { %721 = sbr.rel (%p3847_p6) target bundleno = 2386 (0x952), region = 88  ;;  %s3781_s2 = sshll.u32 (!%p3847_p6), %s3410_s16, 3 }
  0xd1   : > { %s724_s7 = scalar_lea.sflag (!%p3847_p6), [#allocation4], %s3410_s16  ;;  %s3416_s22 = scalar_lea.vmem (!%p3847_p6), [#allocation3], %s3781_s2 }
  0xd7   : > { %2899 = dma.done.wait (%p3848_p8), %s724_s7, 128  }
  0xd8   : > { %2901 = vsyncadd (%p3848_p8), %s724_s7, 4294967168  ;;  %s3849_s20 = sld [smem:[#allocation27_spill]]  ;;  %s3850_s15 = sld [smem:[#allocation17_spill]] }
  0xd9   : > { %s3851_s4 = sld [smem:[#allocation30_spill]] }
  0xde   : > { %s732_s6 = sand.u32 1, %s3849_s20   ;;  %s734_s10 = sand.u32 1, %s3850_s15  }
  0xdf   : > { %s3424_s25 = sshll.u32 %s734_s10, 4  ;;  %s733_s18 = scalar_lea.sflag [#allocation7], %s732_s6 }
  0xe0   : > { %p3852_p1 = scmp.ne.s32.totalorder %s3851_s4, 0 }
  0xe2   : > { %2903 = dma.done.wait (%p3852_p1), %s733_s18, 512  }
  0xe3   : > { %2905 = vsyncadd (%p3852_p1), %s733_s18, 4294966784  ;;  %s751_s24 = scalar_lea.sflag [#allocation10], %s732_s6 }
  0xe4   : > { %2907 = dma.done.wait (%p3852_p1), %s751_s24, 512  }
  0xe5   : > { %2909 = vsyncadd (%p3852_p1), %s751_s24, 4294966784  ;;  %s3853_s12 = sld [smem:[#allocation22_spill]]  ;;  %s3855_s20 = sld [smem:[#allocation35_spill]] }
  0xe6   : > { %s3856_s10 = sld [smem:[#allocation37_spill]]  ;;  %s3858_s9 = sld [smem:[#allocation39_spill]] }
  0xe7   : > { %s3859_s14 = sld [smem:[#allocation40_spill]]  ;;  %s3862_s5 = sld [smem:[#allocation46_spill]] }
  0xe8   : > { %s3864_s17 = sld [smem:[#allocation49_spill]]  ;;  %s763_s4 = scalar_lea.vmem [#allocation11], %s3424_s25 }
  0xe9   : > { %s3866_s6 = sshll.u32 %s3410_s16, 3 }
  0xeb   : > { %p878_p3 = scmp.lt.s32.totalorder %s3853_s12, 1  ;;  %p2291_p7 = scmp.ne.s32.totalorder %s3853_s12, 0 }
  0xec   : > { %v927_v0 = vld [vmem:[%s3416_s22] sm:$0xff] (!%p2291_p7)  ;;  %vm928_vm0 = vcmask (!%p2291_p7), 261120  }
  0xed   : > { %s3439_s23 = scalar_select %p878_p3, %s3853_s12, 1 }
  0xee   : > { %929 = vst.msk [vmem:[#allocation2] sm:$0xff] (!%p2291_p7), %vm928_vm0, %v927_v0 }
  0xef   : > { %s2344_s21 = sshll.u32 %s3439_s23, 4  ;;  %s901_s26 = scalar_lea.vmem %s3859_s14, %s3439_s23 }
  0xf0   : > { %s882_s15 = scalar_lea.vmem %s3855_s20, %s2344_s21  ;;  %s3452_s18 = scalar_lea.vmem %s3856_s10, %s2344_s21 }
  0xf1   : > { %s3461_s13 = scalar_lea.vmem %s3858_s9, %s2344_s21  ;;  %s3861_s10 = sld [smem:[#allocation44_spill]] }
  0xf2   : > { %s910_s24 = scalar_lea.vmem %s3862_s5, %s3439_s23  ;;  %s3863_s9 = sld [smem:[#allocation48_spill]] }
  0xf3   : > { %s2347_s21 = sshll.u32 %s3439_s23, 5  ;;  %s3865_s20 = sld [smem:[#allocation50_spill]] }
  0xf4   : > { %s3487_s14 = scalar_lea.vmem %s3864_s17, %s2347_s21  ;;  %926 = sbr.rel (%p2291_p7) target bundleno = 251 (0xfb), region = 112 }
  0xf7   : > { %s907_s8 = scalar_lea.vmem %s3861_s10, %s3439_s23  ;;  %s3496_s10 = scalar_lea.vmem [#allocation12], %s3866_s6 }
  0xf8   : > { %s913_s2 = scalar_lea.vmem %s3863_s9, %s3439_s23 }
  0xf9   : > { %s921_s28 = scalar_lea.vmem %s3865_s20, %s3439_s23 }
  0xfb PF: > { %v2638_v1 = vld [vmem:[%s882_s15] sm:$0xff]   ;;  %v2965_v2 = vmov 0.0   ;;  %v2639_v3 = vld [vmem:[%s882_s15 + $0x8] sm:$0xff]   ;;  %vm2966_vm1 = vmmov 0   ;;  %vm955_vm2 = vcmask 261120   ;;  %s3867_s22 = sld [smem:[#allocation36_spill]]  ;;  %v1401_v51 = vlaneseq }
  0xfc   : > { %2390 = vmatprep.subr.bf16.mxu0 %v2965_v2  ;;  %2398 = vmatprep.subr.bf16.mxu1 %v2965_v2  ;;  %v930_v4 = vld [vmem:[#allocation2] sm:$0xff]  ;;  %v2642_v8 = vld [vmem:[%s3452_s18 + $0x8] sm:$0xff]   ;;  %s3869_s12 = scalar_lea.vmem [#allocation6], %s3424_s25  ;;  %s3871_s11 = sld [smem:[#allocation38_spill]]  ;;  %vm1216_vm3 = vcmask 64512   ;;  %vm1463_vm4 = vcmask 1043456  }
  0xfd   : > { %2391 = vmatpush3.bf16.msra.mxu0 %v2638_v1  ;;  %2394 = vmatprep.mubr.msk.bf16.mxu0 %vm2966_vm1, %v2965_v2  ;;  %v2640_v5 = vld [vmem:[%s3452_s18] sm:$0xff]   ;;  %v931_v7 = vpack.c.bf16 %v930_v4, %v930_v4  ;;  %v2643_v9 = vld [vmem:[%s3461_s13 + $0x8] sm:$0xff]   ;;  %s2967_s30 = smov 120   ;;  %s2969_s17 = smov 112   ;;  %v1402_v52 = vshrl.u32 %v1401_v51, 7  ;;  %v1404_v53 = vand.u32 127, %v1401_v51 }
  0xfe   : > { %2392 = vmatprep.subr.bf16.mxu0 %v2965_v2  ;;  %2402 = vmatprep.mubr.msk.bf16.mxu1 %vm2966_vm1, %v2965_v2  ;;  %v2641_v6 = vld [vmem:[%s3461_s13] sm:$0xff]   ;;  %v2644_v15 = vld [vmem:[%s3869_s12] sm:$0xff]   ;;  %s3870_s13 = smov %s3869_s12  ;;  %s3874_s20 = sld [smem:[#allocation42_spill]]  ;;  %vm1658_vm6 = vcmask 130048   ;;  %vm1660_vm7 = vcmask 195584   ;;  %vm1907_vm8 = vcmask 523264  }
  0xff   : > { %2399 = vmatpush3.bf16.msra.mxu1 %v2640_v5  ;;  %v2645_v18 = vld [vmem:[%s3870_s13 + $0x8] sm:$0xff]   ;;  %v2300_v20 = vld [vmem:[%s901_s26] ss:$0 sm:$0xff]  ;;  %s2968_s26 = smov 104   ;;  %vm1405_vm5 = vcmp.le.s32.totalorder %v1404_v53, %v1402_v52  ;;  %s3876_s27 = scalar_lea.vmem [#allocation8], %s3424_s25 }
 0x100   : > { %2400 = vmatprep.subr.bf16.mxu1 %v2965_v2  ;;  %s3877_s1 = smov %s3876_s27  ;;  %s2971_s12 = smov 16  }
 0x101   : > { %2393 = vmatpush3.bf16.msra.mxu0 %v2639_v3  ;;  %s3868_s19 = scalar_lea.vmem %s3867_s22, %s3439_s23  ;;  %s3878_s22 = scalar_lea.vmem [#allocation9], %s3424_s25 }
 0x102   : > { %2406 = vmatprep.subr.bf16.mxu0 %v2965_v2  ;;  %v2292_v10 = vld [vmem:[%s3868_s19] ss:$0 sm:$0xff]  ;;  %s3872_s5 = scalar_lea.vmem %s3871_s11, %s3439_s23  ;;  %s2970_s19 = smov 8  }
 0x103   : > { %2401 = vmatpush3.bf16.msra.mxu1 %v2642_v8  ;;  %v2296_v19 = vld [vmem:[%s3872_s5] ss:$0 sm:$0xff]  ;;  %s2972_s13 = smov 24   ;;  %s3879_s15 = smov %s3878_s22 }
 0x104   : > { %2395 = vmatmul.mubr.msk.bf16.vlgmr.msra.gmra.mrb[0].mxu0 %vm955_vm2, %v931_v7  ;;  %2414 = vmatprep.subr.bf16.mxu1 %v2965_v2  ;;  %s3875_s6 = scalar_lea.vmem %s3874_s20, %s3439_s23 }
 0x105   : > { %2407 = vmatpush3.bf16.msra.mxu0 %v2641_v6  ;;  %2410 = vmatprep.mubr.msk.bf16.mxu0 %vm2966_vm1, %v2965_v2  ;;  %v2304_v41 = vld [vmem:[%s3875_s6] ss:$0 sm:$0xff] }
 0x106   : > { %2408 = vmatprep.subr.bf16.mxu0 %v2965_v2 }
 0x109   : > { %2409 = vmatpush3.bf16.msra.mxu0 %v2643_v9 }
 0x10a   : > { %2422 = vmatprep.subr.bf16.mxu0 %v2965_v2 }
 0x1d7   : > { %v993_v11 = vpop.f32.mrb[0].mxu0 }
 0x1d8   : > { %v994_v12 = vadd.f32 %v2292_v10, %v993_v11  ;;  %v2396_v13 = vpop.f32.mrb[1].mxu0 }
 0x1d9   : > { %v996_v14 = vpop.f32.mrb[2].mxu0 }
 0x1da   : > { %v999_v16 = vpack.c.bf16 %v994_v12, %v994_v12  ;;  %v2397_v17 = vpop.f32.mrb[3].mxu0 }
 0x1dc   : > { %2403 = vmatmul.mubr.msk.bf16.vlgmr.msra.gmra.mrb[0].mxu1 %vm955_vm2, %v999_v16  ;;  %2411 = vmatmul.mubr.msk.bf16.vlgmr.msra.gmra.mrb[4].mxu0 %vm955_vm2, %v999_v16 }
 0x1dd   : > { %2415 = vmatpush3.bf16.msra.mxu1 %v2644_v15  ;;  %2418 = vmatprep.mubr.msk.bf16.mxu1 %vm2966_vm1, %v2965_v2 }
 0x1de   : > { %2416 = vmatprep.subr.bf16.mxu1 %v2965_v2  ;;  %2424 = vmatprep.mubr.msk.bf16.mxu0 %vm2966_vm1, %v2965_v2 }
 0x1e1   : > { %2417 = vmatpush3.bf16.msra.mxu1 %v2645_v18 }
 0x1e2   : > { %2428 = vmatprep.subr.bf16.mxu1 %v2965_v2 }
 0x1e4   : > { %2419 = vmatmul.mubr.msk.bf16.vlgmr.msra.gmra.mrb[4].mxu1 %vm955_vm2, %v999_v16 }
 0x1e5   : > { %2430 = vmatprep.mubr.msk.bf16.mxu1 %vm2966_vm1, %v2965_v2 }
 0x2af   : > { %v1060_v21 = vpop.f32.mrb[0].mxu1  ;;  %v1123_v22 = vpop.f32.mrb[4].mxu0 }
 0x2b0   : > { %v1061_v23 = vadd.f32 %v2296_v19, %v1060_v21  ;;  %v1124_v24 = vadd.f32 %v2300_v20, %v1123_v22  ;;  %v2404_v25 = vpop.f32.mrb[1].mxu1  ;;  %v2412_v26 = vpop.f32.mrb[5].mxu0 }
 0x2b1   : > { %v1063_v27 = vpop.f32.mrb[2].mxu1  ;;  %v1126_v28 = vpop.f32.mrb[6].mxu0 }
 0x2b2   : > { %v1192_v29 = vpack.c.bf16 %v1061_v23, %v1061_v23  ;;  %v1193_v30 = vpack.c.bf16 %v1124_v24, %v1124_v24  ;;  %v2405_v31 = vpop.f32.mrb[3].mxu1  ;;  %v2413_v32 = vpop.f32.mrb[7].mxu0 }
 0x2b4   : > { %1196 = vrot.lane.b32.xlu1 %v1192_v29, %s2967_s30  ;;  %1203 = vrot.lane.b32.xlu0 %v1193_v30, %s2967_s30  ;;  %v1221_v33 = vsel %vm1216_vm3, %v1193_v30, 0 }
 0x2b5   : > { %2423 = vmatpush3.bf16.xpose.msra.mxu0 %v1221_v33 }
 0x2b6   : > { %2434 = vmatprep.subr.bf16.mxu0 %v2965_v2 }
 0x2b7   : > { %v1186_v34 = vpop.f32.mrb[4].mxu1 }
 0x2b8   : > { %v2420_v35 = vpop.f32.mrb[5].mxu1  ;;  %1207 = vrot.lane.b32.xlu1 %v1193_v30, %s2968_s26  ;;  %1205 = vrot.lane.b32.xlu0 %v1193_v30, %s2969_s17  ;;  %v1187_v43 = vadd.f32 %v2304_v41, %v1186_v34 }
 0x2b9   : > { %v1189_v36 = vpop.f32.mrb[6].mxu1 }
 0x2ba   : > { %v2421_v37 = vpop.f32.mrb[7].mxu1  ;;  %v3569_v46 = vpack.c.bf16 %v1187_v43, %v1187_v43 }
 0x2bc   : > { %1200 = vrot.lane.b32.xlu1 %v1192_v29, %s2968_s26  ;;  %1198 = vrot.lane.b32.xlu0 %v1192_v29, %s2969_s17  ;;  %v1465_v49 = vsel %vm1463_vm4, %v3569_v46, 0 }
 0x2bd   : > { %2425 = vmatmul.mubr.msk.bf16.vlgmr.msra.gmra.mrb[8].mxu0 %vm1216_vm3, %v1192_v29 }
 0x2be   : > { %2436 = vmatprep.mubr.msk.bf16.mxu0 %vm2966_vm1, %v2965_v2 }
 0x326   : > { %v1197_v38 = vpop.permute.xlu1 %1196  ;;  %v1204_v39 = vpop.permute.xlu0 %1203 }
 0x327   : > { %v1267_v40 = vsel %vm1216_vm3, %v1204_v39, 0 }
 0x328   : > { %2429 = vmatpush3.bf16.xpose.msra.mxu1 %v1267_v40 }
 0x329   : > { %2440 = vmatprep.subr.bf16.mxu1 %v2965_v2 }
 0x32a   : > { %v1206_v42 = vpop.permute.xlu0 %1205  ;;  %v1208_v45 = vpop.permute.xlu1 %1207 }
 0x32b   : > { %v1313_v44 = vsel %vm1216_vm3, %v1206_v42, 0  ;;  %v1359_v47 = vsel %vm1216_vm3, %v1208_v45, 0 }
 0x32c   : > { %2435 = vmatpush3.bf16.xpose.msra.mxu0 %v1313_v44 }
 0x32d   : > { %2446 = vmatprep.subr.bf16.mxu0 %v2965_v2 }
 0x32e   : > { %v1199_v48 = vpop.permute.xlu0 %1198  ;;  %v1201_v50 = vpop.permute.xlu1 %1200 }
 0x32f   : > { %2431 = vmatmul.mubr.msk.bf16.vlgmr.msra.gmra.mrb[8].mxu1 %vm1216_vm3, %v1197_v38 }
 0x330   : > { %2441 = vmatpush3.bf16.xpose.msra.mxu1 %v1359_v47  ;;  %2442 = vmatprep.mubr.msk.bf16.mxu1 %vm2966_vm1, %v2965_v2 }
 0x331   : > { %2452 = vmatprep.subr.bf16.mxu1 %v2965_v2 }
 0x333   : > { %2437 = vmatmul.mubr.msk.bf16.vlgmr.msra.gmra.mrb[12].mxu0 %vm1216_vm3, %v1199_v48 }
 0x334   : > { %2447 = vmatpush3.bf16.msra.mxu0 %v1465_v49  ;;  %2448 = vmatprep.mubr.msk.bf16.mxu0 %vm2966_vm1, %v2965_v2 }
 0x335   : > { %2458 = vmatprep.subr.bf16.mxu0 %v2965_v2 }
 0x337   : > { %2443 = vmatmul.mubr.msk.bf16.vlgmr.msra.gmra.mrb[12].mxu1 %vm1216_vm3, %v1201_v50 }
 0x338   : > { %2454 = vmatprep.mubr.msk.bf16.mxu1 %vm2966_vm1, %v2965_v2 }
 0x390   : > { %v1257_v54 = vpop.f32.mrb[8].mxu0 }
 0x391   : > { %v1408_v55 = vsel %vm1405_vm5, %v1257_v54, -inf  ;;  %v2426_v56 = vpop.f32.mrb[9].mxu0 }
 0x392   : > { %v1260_v57 = vpop.f32.mrb[10].mxu0  ;;  %v1412_v58 = vsel %vm1216_vm3, %v1408_v55, -inf }
 0x393   : > { %1413 = vmax.xlane.f32.xlu0 %v1412_v58  ;;  %v2427_v59 = vpop.f32.mrb[11].mxu0 }
 0x402   : > { %v1303_v60 = vpop.f32.mrb[8].mxu1 }
 0x403   : > { %v1409_v61 = vsel %vm1405_vm5, %v1303_v60, -inf  ;;  %v2432_v62 = vpop.f32.mrb[9].mxu1 }
 0x404   : > { %v1306_v63 = vpop.f32.mrb[10].mxu1  ;;  %v1415_v0 = vsel %vm1216_vm3, %v1409_v61, -inf  ;;  %v2647_v62 = vld [vmem:[%s3877_s1 + $0x8] sm:$0xff]  }
 0x405   : > { %1416 = vmax.xlane.f32.xlu1 %v1415_v0  ;;  %v2433_v1 = vpop.f32.mrb[11].mxu1  ;;  %v2648_v63 = vld [vmem:[%s3878_s22] sm:$0xff]  }
 0x406   : > { %v1349_v3 = vpop.f32.mrb[12].mxu0 }
 0x407   : > { %v1410_v4 = vsel %vm1405_vm5, %v1349_v3, -inf  ;;  %v2438_v5 = vpop.f32.mrb[13].mxu0 }
 0x408   : > { %v1352_v6 = vpop.f32.mrb[14].mxu0  ;;  %v1418_v7 = vsel %vm1216_vm3, %v1410_v4, -inf }
 0x409   : > { %1419 = vmax.xlane.f32.xlu0 %v1418_v7  ;;  %v2439_v8 = vpop.f32.mrb[15].mxu0 }
 0x40a   : > { %v1395_v9 = vpop.f32.mrb[12].mxu1 }
 0x40b   : > { %v1411_v10 = vsel %vm1405_vm5, %v1395_v9, -inf  ;;  %v2444_v11 = vpop.f32.mrb[13].mxu1 }
 0x40c   : > { %v1398_v12 = vpop.f32.mrb[14].mxu1  ;;  %v1421_v13 = vsel %vm1216_vm3, %v1411_v10, -inf }
 0x40d   : > { %v2445_v14 = vpop.f32.mrb[15].mxu1  ;;  %1422 = vmax.xlane.f32.xlu0 %v1421_v13 }
 0x416   : > { %1210 = vrot.lane.b32.xlu1 %v3569_v46, %s2967_s30 }
 0x420   : > { %v1414_v15 = vpop.xlane.xlu0 %1413 }
 0x421   : > { %v1424_v16 = vsub.f32 %v1408_v55, %v1414_v15 }
 0x423   : > { %v1428_v17 = vmul.f32 1.442695, %v1424_v16 }
 0x425   : > { %2656 = vpow2.f32 %v1428_v17 }
 0x42f   : > { %v2657_v18 = vpop.eup %2656 }
 0x430   : > { %v1436_v19 = vsel %vm1216_vm3, %v2657_v18, 0.0 }
 0x43a   : > { %1437 = vadd.xlane.f32.xlu1 %v1436_v19  ;;  %v2649_v19 = vld [vmem:[%s763_s4] sm:$0xff]  }
 0x492   : > { %v1417_v20 = vpop.xlane.xlu1 %1416 }
 0x493   : > { %v1425_v21 = vsub.f32 %v1409_v61, %v1417_v20  ;;  %v2646_v61 = vld [vmem:[%s3876_s27] sm:$0xff]  }
 0x495   : > { %v1430_v22 = vmul.f32 1.442695, %v1425_v21  ;;  %v2650_v21 = vld [vmem:[%s3879_s15 + $0x8] sm:$0xff]  }
 0x496   : > { %v1211_v23 = vpop.permute.xlu1 %1210  ;;  %v1420_v24 = vpop.xlane.xlu0 %1419 }
 0x497   : > { %2658 = vpow2.f32 %v1430_v22  ;;  %v1511_v25 = vsel %vm1463_vm4, %v1211_v23, 0  ;;  %v1426_v26 = vsub.f32 %v1410_v4, %v1420_v24  ;;  %v2651_v22 = vld [vmem:[%s763_s4 + $0x8] sm:$0xff]  }
 0x498   : > { %2453 = vmatpush3.bf16.msra.mxu1 %v1511_v25  ;;  %v2316_v23 = vld [vmem:[%s907_s8] ss:$0 sm:$0xff] }
 0x499   : > { %v1432_v27 = vmul.f32 1.442695, %v1426_v26  ;;  %2464 = vmatprep.subr.bf16.mxu1 %v2965_v2 }
 0x49a   : > { %v1423_v28 = vpop.xlane.xlu0 %1422 }
 0x49b   : > { %2660 = vpow2.f32 %v1432_v27  ;;  %v1427_v29 = vsub.f32 %v1411_v10, %v1423_v28 }
 0x49d   : > { %v1434_v30 = vmul.f32 1.442695, %v1427_v29 }
 0x49f   : > { %2662 = vpow2.f32 %v1434_v30  ;;  %v2652_v30 = vld [vmem:[%s3487_s14] sm:$0xff]  }
 0x4a1   : > { %v2659_v31 = vpop.eup %2658 }
 0x4a2   : > { %v1439_v32 = vsel %vm1216_vm3, %v2659_v31, 0.0 }
 0x4a3   : > { %1440 = vadd.xlane.f32.xlu0 %v1439_v32  ;;  %v2654_v32 = vld [vmem:[%s3487_s14 + $0x10] sm:$0xff]  }
 0x4a5   : > { %v2661_v33 = vpop.eup %2660 }
 0x4a6   : > { %v1442_v34 = vsel %vm1216_vm3, %v2661_v33, 0.0 }
 0x4a7   : > { %1443 = vadd.xlane.f32.xlu1 %v1442_v34  ;;  %v2324_v34 = vld [vmem:[%s913_s2] ss:$0 sm:$0xff] }
 0x4a9   : > { %v2663_v35 = vpop.eup %2662 }
 0x4aa   : > { %v1445_v36 = vsel %vm1216_vm3, %v2663_v35, 0.0 }
 0x4ab   : > { %1446 = vadd.xlane.f32.xlu0 %v1445_v36 }
 0x4b8   : > { %1214 = vrot.lane.b32.xlu1 %v3569_v46, %s2968_s26 }
 0x4c1   : > { %1212 = vrot.lane.b32.xlu0 %v3569_v46, %s2969_s17 }
 0x4c7   : > { %v1438_v37 = vpop.xlane.xlu1 %1437 }
 0x4c8   : > { %2664 = vrcp.f32 %v1438_v37 }
 0x4d2   : > { %v2665_v38 = vpop.eup %2664 }
 0x4d3   : > { %v1452_v39 = vmul.f32 %v2665_v38, %v2657_v18 }
 0x4d5   : > { %v1456_v40 = vpack.c.bf16 %v1452_v39, %v1452_v39 }
 0x4d7   : > { %2449 = vmatmul.mubr.msk.bf16.vlgmr.msra.gmra.mrb[16].mxu0 %vm1216_vm3, %v1456_v40 }
 0x4d8   : > { %2460 = vmatprep.mubr.msk.bf16.mxu0 %vm2966_vm1, %v2965_v2 }
 0x530   : > { %v1441_v41 = vpop.xlane.xlu0 %1440 }
 0x531   : > { %2666 = vrcp.f32 %v1441_v41 }
 0x534   : > { %v1444_v42 = vpop.xlane.xlu1 %1443 }
 0x535   : > { %2668 = vrcp.f32 %v1444_v42 }
 0x538   : > { %v1447_v43 = vpop.xlane.xlu0 %1446  ;;  %v1215_v46 = vpop.permute.xlu1 %1214 }
 0x539   : > { %2670 = vrcp.f32 %v1447_v43  ;;  %v1603_v52 = vsel %vm1463_vm4, %v1215_v46, 0 }
 0x53b   : > { %v2667_v44 = vpop.eup %2666 }
 0x53c   : > { %v1453_v45 = vmul.f32 %v2667_v44, %v2659_v31  ;;  %v1213_v47 = vpop.permute.xlu0 %1212  ;;  %v2653_v31 = vld [vmem:[%s3487_s14 + $0x8] sm:$0xff]  }
 0x53d   : > { %v1557_v48 = vsel %vm1463_vm4, %v1213_v47, 0  ;;  %v2320_v47 = vld [vmem:[%s910_s24] ss:$0 sm:$0xff]  ;;  %s3884_s24 = sld [smem:[#allocation22_spill]] }
 0x53e   : > { %2459 = vmatpush3.bf16.msra.mxu0 %v1557_v48  ;;  %v1457_v49 = vpack.c.bf16 %v1453_v45, %v1453_v45 }
 0x53f   : > { %v2669_v50 = vpop.eup %2668  ;;  %2470 = vmatprep.subr.bf16.mxu0 %v2965_v2 }
 0x540   : > { %v1454_v51 = vmul.f32 %v2669_v50, %v2661_v33  ;;  %2455 = vmatmul.mubr.msk.bf16.vlgmr.msra.gmra.mrb[16].mxu1 %vm1216_vm3, %v1457_v49  ;;  %v2655_v33 = vld [vmem:[%s3487_s14 + $0x18] sm:$0xff]  }
 0x541   : > { %2465 = vmatpush3.bf16.msra.mxu1 %v1603_v52  ;;  %2466 = vmatprep.mubr.msk.bf16.mxu1 %vm2966_vm1, %v2965_v2  ;;  %v2329_v52 = vld [vmem:[%s921_s28] ss:$0 sm:$0xff] }
 0x542   : > { %v1458_v53 = vpack.c.bf16 %v1454_v51, %v1454_v51  ;;  %2478 = vmatprep.subr.bf16.mxu1 %v2965_v2 }
 0x543   : > { %v2671_v54 = vpop.eup %2670  ;;  %p2335_p10 = scmp.ne.s32.totalorder %s3884_s24, 1 }
 0x544   : > { %v1455_v55 = vmul.f32 %v2671_v54, %v2663_v35  ;;  %2461 = vmatmul.mubr.msk.bf16.vlgmr.msra.gmra.mrb[20].mxu0 %vm1216_vm3, %v1458_v53 }
 0x545   : > { %2474 = vmatprep.mubr.msk.bf16.mxu0 %vm2966_vm1, %v2965_v2  ;;  %2471 = vmatpush3.bf16.msra.mxu0 %v2646_v61 }
 0x546   : > { %v1459_v56 = vpack.c.bf16 %v1455_v55, %v1455_v55  ;;  %2472 = vmatprep.subr.bf16.mxu0 %v2965_v2 }
 0x548   : > { %2467 = vmatmul.mubr.msk.bf16.vlgmr.msra.gmra.mrb[20].mxu1 %vm1216_vm3, %v1459_v56 }
 0x549   : > { %2482 = vmatprep.mubr.msk.bf16.mxu1 %vm2966_vm1, %v2965_v2  ;;  %2473 = vmatpush3.bf16.msra.mxu0 %v2647_v62 }
 0x54a   : > { %2486 = vmatprep.subr.bf16.mxu0 %v2965_v2  ;;  %2479 = vmatpush3.bf16.msra.mxu1 %v2648_v63 }
 0x54b   : > { %2480 = vmatprep.subr.bf16.mxu1 %v2965_v2 }
 0x54e   : > { %2481 = vmatpush3.bf16.msra.mxu1 %v2650_v21 }
 0x54f   : > { %2494 = vmatprep.subr.bf16.mxu1 %v2965_v2 }
 0x5aa   : > { %v1501_v57 = vpop.f32.mrb[16].mxu0 }
 0x5ab   : > { %v2450_v58 = vpop.f32.mrb[17].mxu0 }
 0x5ac   : > { %v1504_v59 = vpop.f32.mrb[18].mxu0 }
 0x5ad   : > { %v2451_v60 = vpop.f32.mrb[19].mxu0 }
 0x613   : > { %v1547_v0 = vpop.f32.mrb[16].mxu1 }
 0x614   : > { %1646 = vrot.lane.b32.xlu1 %v1547_v0, %s2970_s19  ;;  %v2456_v1 = vpop.f32.mrb[17].mxu1 }
 0x615   : > { %v1550_v3 = vpop.f32.mrb[18].mxu1 }
 0x616   : > { %v2457_v4 = vpop.f32.mrb[19].mxu1 }
 0x617   : > { %v1593_v5 = vpop.f32.mrb[20].mxu0 }
 0x618   : > { %1650 = vrot.lane.b32.xlu0 %v1593_v5, %s2971_s12  ;;  %v2462_v6 = vpop.f32.mrb[21].mxu0 }
 0x619   : > { %v1596_v7 = vpop.f32.mrb[22].mxu0 }
 0x61a   : > { %v2463_v8 = vpop.f32.mrb[23].mxu0 }
 0x61b   : > { %v1639_v9 = vpop.f32.mrb[20].mxu1 }
 0x61c   : > { %1654 = vrot.lane.b32.xlu1 %v1639_v9, %s2972_s13  ;;  %v2468_v10 = vpop.f32.mrb[21].mxu1 }
 0x61d   : > { %v1642_v11 = vpop.f32.mrb[22].mxu1 }
 0x61e   : > { %v2469_v12 = vpop.f32.mrb[23].mxu1 }
 0x686   : > { %v1647_v13 = vpop.permute.xlu1 %1646 }
 0x687   : > { %v1657_v15 = vsel %vm1216_vm3, %v1501_v57, %v1647_v13 }
 0x68a   : > { %v1651_v14 = vpop.permute.xlu0 %1650 }
 0x68b   : > { %v1659_v16 = vsel %vm1658_vm6, %v1657_v15, %v1651_v14 }
 0x68e   : > { %v1655_v17 = vpop.permute.xlu1 %1654 }
 0x68f   : > { %v1661_v18 = vsel %vm1660_vm7, %v1659_v16, %v1655_v17 }
 0x690   : > { %v1662_v20 = vpack.c.bf16 %v1661_v18, %v1661_v18 }
 0x692   : > { %2475 = vmatmul.mubr.msk.bf16.vlgmr.msra.gmra.mrb[24].mxu0 %vm955_vm2, %v1662_v20 }
 0x693   : > { %2487 = vmatpush3.bf16.msra.mxu0 %v2649_v19  ;;  %2490 = vmatprep.mubr.msk.bf16.mxu0 %vm2966_vm1, %v2965_v2 }
 0x694   : > { %2488 = vmatprep.subr.bf16.mxu0 %v2965_v2 }
 0x697   : > { %2489 = vmatpush3.bf16.msra.mxu0 %v2651_v22 }
 0x765   : > { %v1723_v24 = vpop.f32.mrb[24].mxu0 }
 0x766   : > { %v1724_v25 = vadd.f32 %v2316_v23, %v1723_v24  ;;  %v2476_v26 = vpop.f32.mrb[25].mxu0 }
 0x767   : > { %v1726_v27 = vpop.f32.mrb[26].mxu0 }
 0x768   : > { %v1729_v28 = vpack.c.bf16 %v1724_v25, %v1724_v25  ;;  %v2477_v29 = vpop.f32.mrb[27].mxu0 }
 0x76a   : > { %2483 = vmatmul.mubr.msk.bf16.vlgmr.msra.gmra.mrb[24].mxu1 %vm955_vm2, %v1729_v28  ;;  %2491 = vmatmul.mubr.msk.bf16.vlgmr.msra.gmra.mrb[28].mxu0 %vm955_vm2, %v1729_v28 }
 0x76b   : > { %2502 = vmatprep.mubr.msk.bf16.mxu1 %vm2966_vm1, %v2965_v2  ;;  %2495 = vmatpush3.bf16.msra.mxu1 %v2652_v30 }
 0x76c   : > { %2496 = vmatprep.subr.bf16.mxu1 %v2965_v2 }
 0x76f   : > { %2497 = vmatpush3.bf16.msra.mxu1 %v2653_v31 }
 0x770   : > { %2498 = vmatprep.subr.bf16.mxu1 %v2965_v2 }
 0x773   : > { %2499 = vmatpush3.bf16.msra.mxu1 %v2654_v32 }
 0x774   : > { %2500 = vmatprep.subr.bf16.mxu1 %v2965_v2 }
 0x777   : > { %2501 = vmatpush3.bf16.msra.mxu1 %v2655_v33 }
 0x83d   : > { %v1790_v35 = vpop.f32.mrb[24].mxu1  ;;  %v1853_v36 = vpop.f32.mrb[28].mxu0 }
 0x83e   : > { %v1854_v37 = vadd.f32 %v2324_v34, %v1853_v36  ;;  %v2484_v38 = vpop.f32.mrb[25].mxu1  ;;  %v2492_v39 = vpop.f32.mrb[29].mxu0  ;;  %v1791_v48 = vadd.f32 %v2320_v47, %v1790_v35 }
 0x83f   : > { %v1793_v40 = vpop.f32.mrb[26].mxu1  ;;  %v1856_v41 = vpop.f32.mrb[30].mxu0 }
 0x840   : > { %v2328_v42 = vmul.f32 -1.442695, %v1854_v37  ;;  %v2485_v43 = vpop.f32.mrb[27].mxu1  ;;  %v2493_v44 = vpop.f32.mrb[31].mxu0 }
 0x842   : > { %2672 = vpow2.f32 %v2328_v42 }
 0x84c   : > { %v2673_v2 = vpop.eup %2672 }
 0x84d   : > { %v1862_v45 = vadd.f32 1.0, %v2673_v2 }
 0x84f   : > { %2674 = vrcp.f32 %v1862_v45 }
 0x859   : > { %v2675_v46 = vpop.eup %2674 }
 0x85a   : > { %v1865_v49 = vmul.f32 %v2675_v46, %v1854_v37 }
 0x85c   : > { %v1866_v50 = vmul.f32 %v1865_v49, %v1791_v48 }
 0x85e   : > { %v1867_v51 = vpack.c.bf16 %v1866_v50, %v1866_v50 }
 0x860   : > { %2503 = vmatmul.mubr.msk.bf16.vlgmr.msra.gmra.mrb[28].mxu1 %vm1907_vm8, %v1867_v51 }
 0x930   : > { %1955 = sbr.rel (%p2335_p10) target bundleno = 2359 (0x937), region = 116 }
 0x933   : > { %v1945_v53 = vpop.f32.mrb[28].mxu1 }
 0x934   : > { %v1946_v54 = vadd.f32 %v2329_v52, %v1945_v53  ;;  %v2504_v55 = vpop.f32.mrb[29].mxu1 }
 0x935   : > { %v1948_v56 = vpop.f32.mrb[30].mxu1 }
 0x936   : > { %1951 = vst.msk [vmem:[#allocation2] sm:$0xff] %vm955_vm2, %v1946_v54  ;;  %v2505_v57 = vpop.f32.mrb[31].mxu1  ;;  %1956 = vst.msk [vmem:[%s3496_s10] sm:$0xff] (!%p2335_p10), %vm955_vm2, %v1946_v54 }
 0x937 PF: > { %s3885_s26 = sld [smem:[#allocation23_spill]]  ;;  %s3886_s29 = sld [smem:[#allocation51_spill]] }
 0x938   : > { %s1971_s6 = sshll.u32 %s3496_s10, 4  ;;  %s1958_s27 = scalar_lea.sflag [#allocation5], %s3410_s16  ;;  %s1972_s6 = int_to_ptr.vmem [resolvable:$true] %s1971_s6 }
 0x939   : > { %s2826_s1 = scalar_lea.vmem %s1972_s6, 128  ;;  %p3888_p4 = scmp.ne.s32.totalorder %s3838_s0, 0 }
 0x93a   : > { %p2827_p0 = scmp.ne.s32.totalorder %s1972_s6, %s2826_s1  ;;  %s2973_s22 = smov [#allocation12]  }
 0x93b   : > { %s2830_s19 = sshll.u32 %s2973_s22, 4  ;;  %s2831_s19 = int_to_ptr.vmem [resolvable:$false] %s2830_s19 }
 0x93c   : > { %p2828_p11 = pnand %p2827_p0, %p3888_p4  ;;  %s2832_s12 = scalar_lea.vmem %s2831_s19, 256 }
 0x93d   : > { %s2337_s23 = sshll.u32 %s3885_s26, 7  ;;  %s3887_s7 = smov %s3886_s29 }
 0x93e   : > { %s3681_s20 = scalar_lea.hbm %s3886_s29, %s2337_s23  ;;  %p2829_p5 = pneg %p2828_p11 }
 0x93f   : > { %p2833_p13 = scmp.lt.s32.totalorder %s1972_s6, %s2831_s19  ;;  %p2834_p12 = scmp.lt.s32.totalorder %s2832_s12, %s2826_s1 }
 0x941   : > { %p2835_p2 = por %p2834_p12, %p2833_p13 }
 0x943   : > { %p2836_p9 = pnand %p2835_p2, %p2829_p5 }
 0x945   : > { %2839 = shalt.err (!%p2836_p9)
}
 0x946   : > { %s2840_s16 = scalar_lea.hbm %s3681_s20, 128  ;;  %s2844_s15 = scalar_lea.hbm %s3887_s7, 256 }
 0x947   : > { %p2841_p6 = scmp.ne.s32.totalorder %s3681_s20, %s2840_s16  ;;  %p2845_p3 = scmp.lt.u32.totalorder %s3681_s20, %s3887_s7 }
 0x948   : > { %p2846_p7 = scmp.lt.u32.totalorder %s2844_s15, %s2840_s16  ;;  %p2848_p0 = scmp.lt.u32.totalorder %s2840_s16, %s3681_s20 }
 0x949   : > { %p2842_p8 = pnand %p2841_p6, %p3888_p4 }
 0x94a   : > { %p2847_p10 = por %p2846_p7, %p2845_p3 }
 0x94b   : > { %p2843_p1 = pneg %p2842_p8 }
 0x94c   : > { %p2849_p11 = por %p2848_p0, %p2847_p10 }
 0x94e   : > { %p2850_p5 = pnand %p2849_p11, %p2843_p1 }
 0x950   : > { %2853 = shalt.err (!%p2850_p5)
}
 0x951   : > { %2516 = dma.vmem_to_hbm [thread:$0]  (%p3888_p4), %s1972_s6, 128, %s3681_s20, %s1958_s27  }
 0x952 PF: > { %s3889_s5 = sld [smem:[#allocation26_spill]]  ;;  %s3890_s8 = sld [smem:[#allocation19_spill]] }
 0x953   : > { %s3891_s25 = sld [smem:[#allocation33_spill]] }
 0x958   : > { %p2539_p13 = scmp.ge.s32.totalorder %s3889_s5, 2  ;;  %s1983_s4 = sand.u32 1, %s3890_s8  }
 0x959   : > { %p3892_p12 = scmp.ne.s32.totalorder %s3891_s25, 0  ;;  %s1984_s14 = scalar_lea.sflag [#allocation5], %s1983_s4 }
 0x95b   : > { %p2535_p2 = pnand %p2539_p13, %p3892_p12 }
 0x95d   : > { %2911 = dma.done.wait (!%p2535_p2), %s1984_s14, 128  }
 0x95e   : > { %2913 = vsyncadd (!%p2535_p2), %s1984_s14, 4294967168  ;;  %s39_s1 = sadd.s32 1, %s3889_s5   ;;  %s3893_s24 = sld [smem:[#allocation17_spill]] }
 0x95f   : > { %p36_p9 = scmp.ge.s32.totalorder %s39_s1, 6   ;;  %s3894_s25 = sld [smem:[#allocation18_spill]] }
 0x960   : > { %s3895_s26 = sld [smem:[#allocation31_spill]]  ;;  %s3896_s27 = sld [smem:[#allocation20_spill]] }
 0x961   : > { %s3897_s28 = sld [smem:[#allocation21_spill]]  ;;  %s3898_s29 = sld [smem:[#allocation32_spill]] }
 0x962   : > { %s3899_s0 = sld [smem:[#allocation24_spill]]  ;;  %s3900_s30 = sld [smem:[#allocation25_spill]] }
 0x963   : > { %s3901_s18 = sld [smem:[#allocation28_spill]]  ;;  %s3902_s19 = sld [smem:[#allocation29_spill]] }
 0x964   :  { %38 = sbr.rel (!%p36_p9) target bundleno = 32 (0x20), region = 225 }
 0x96b   :  { %1989 = vsyncpa [#allocation4], 1 }
 0x96c   :  { %1991 = vsyncpa [#allocation4 + $0x1], 1 }
 0x96d   :  { %1992 = vsyncpa [#allocation7], 1 }
 0x96e   :  { %1994 = vsyncpa [#allocation7 + $0x1], 1 }
 0x96f   :  { %1995 = vsyncpa [#allocation10], 1 }
 0x970   :  { %1997 = vsyncpa [#allocation10 + $0x1], 1 }
 0x971   :  { %1998 = vsyncpa [#allocation5], 1 }
 0x972   :  { %2000 = vsyncpa [#allocation5 + $0x1], 1 }

</bundles_post_ra>
